<compile_context>
chip_gen: v6e
topology: v6e:2x2x1
jax: 0.10.0
libtpu: 0.0.40
codegen_flags: <defaults>
</compile_context>

<pallas_src>
import jax
import jax.numpy as jnp
from jax.experimental import pallas as pl
from jax.experimental.pallas import tpu as pltpu

_SQRT_2_OVER_PI = 0.7978845608028654


def _gelu_tanh(x):
    # tanh-approximate GELU: a handful of VALU ops + one EUP tanh per element.
    return 0.5 * x * (1.0 + jnp.tanh(_SQRT_2_OVER_PI * (x + 0.044715 * x * x * x)))


def _make_kernel(hidden_size, num_hidden_layers):
    H, L = hidden_size, num_hidden_layers

    def kernel(xa_ref, m_ref, b_ref, wxb_ref, w0c_ref, wcp_ref, wocp_ref,
               out_ref, cp_ref, xb_ref):
        # CenteredLinearMap on the real feature rows; the ones-row has m=1, b=0 and
        # the zero-padded rows have m=0, b=0, so they pass through unchanged.
        xa = xa_ref[...] * m_ref[...] + b_ref[...]            # (8, TB)

        # Every layer's x-projection + bias in ONE hoisted MXU matmul:
        #   rows [0:H)            -> inLayer
        #   rows [H(1+j):H(2+j))  -> hidden layer j
        #   row  (L+1)*H          -> outLayer
        xb_ref[...] = jnp.dot(wxb_ref[...], xa,
                              preferred_element_type=jnp.float32)

        # Input layer.
        cur = _gelu_tanh(xb_ref[0:H, :])

        # Hidden layer 0: no `prev` yet (static skip — no dead zero matmul).
        z = (jnp.dot(w0c_ref[...], cur, preferred_element_type=jnp.float32)
             + xb_ref[H:2 * H, :])
        cp_ref[H:2 * H, :] = cur                 # prev <- cur
        cp_ref[0:H, :] = _gelu_tanh(z)           # cur  <- gelu(z)

        # Hidden layers 1..L-1: one fused (H, 2H) @ (2H, TB) matmul per layer.
        for j in range(1, L):
            z = (jnp.dot(wcp_ref[j - 1], cp_ref[...],
                         preferred_element_type=jnp.float32)
                 + xb_ref[(1 + j) * H:(2 + j) * H, :])
            cp_ref[H:2 * H, :] = cp_ref[0:H, :]  # prev <- cur
            cp_ref[0:H, :] = _gelu_tanh(z)       # cur  <- gelu(z)

        # Output layer (M padded to 8 for a clean MXU shape) + (tanh + 1)/2,
        # written as a lane-dense (1, TB) slab.
        r0 = (L + 1) * H
        y = (jnp.dot(wocp_ref[...], cp_ref[...],
                     preferred_element_type=jnp.float32)[0:1]
             + xb_ref[r0:r0 + 1, :])
        out_ref[...] = (jnp.tanh(y) + 1.0) * 0.5

    return kernel


def _pick_tile_b(padded_batch):
    # Lane-dense tiles (multiples of 128).  Keep >= 2 grid steps when possible so
    # dimension_semantics=("parallel",) can feed both TensorCores on v7x.
    for t in (2048, 1024, 512, 256, 128):
        if 2 * t <= padded_batch and padded_batch % t == 0:
            return t
    return padded_batch


def skipconn_forward(x, p, *, tile_b=None):
    B, init = x.shape
    H = p["w0c"].shape[0]
    L = p["num_hidden_layers"]
    k_aug = p["m_aug"].shape[0]
    rp = p["wxb"].shape[0]

    # Pad batch to a lane multiple; build transposed, ones-augmented input (8, Bp).
    Bp = ((B + 127) // 128) * 128
    xa = jnp.zeros((k_aug, Bp), jnp.float32)
    xa = xa.at[:init, :B].set(x.T.astype(jnp.float32))
    xa = xa.at[init, :].set(1.0)                 # homogeneous row -> folds biases in

    if tile_b is None:
        tile_b = _pick_tile_b(Bp)
    assert Bp % tile_b == 0 and tile_b % 128 == 0

    def const_spec(shape):
        nd = len(shape)
        return pl.BlockSpec(shape, lambda i, _nd=nd: (0,) * _nd)

    out_t = pl.pallas_call(
        _make_kernel(H, L),
        out_shape=jax.ShapeDtypeStruct((1, Bp), jnp.float32),
        grid=(Bp // tile_b,),
        in_specs=[
            pl.BlockSpec((k_aug, tile_b), lambda i: (0, i)),   # x (transposed, aug)
            const_spec(p["m_aug"].shape),                      # linmap m
            const_spec(p["b_aug"].shape),                      # linmap b
            const_spec(p["wxb"].shape),                        # stacked x-proj + biases
            const_spec(p["w0c"].shape),                        # hidden-0 cur block
            const_spec(p["wcp"].shape),                        # hidden-j [cur|prev] blocks
            const_spec(p["wocp"].shape),                       # out-layer [cur|prev] block
        ],
        out_specs=pl.BlockSpec((1, tile_b), lambda i: (0, i)),
        scratch_shapes=[
            pltpu.VMEM((2 * H, tile_b), jnp.float32),          # persistent [cur; prev]
            pltpu.VMEM((rp, tile_b), jnp.float32),             # hoisted x-proj + biases
        ],
        compiler_params=pltpu.CompilerParams(
            dimension_semantics=("parallel",)),
    )(xa, p["m_aug"], p["b_aug"], p["wxb"], p["w0c"], p["wcp"], p["wocp"])

    return out_t[:, :B].T                        # back to (B, 1)


# ------------------------- parameter construction -------------------------

def init_ref_params(key, hidden_size, num_hidden_layers, init_size,
                    xmin=-2.5, xmax=1.0, ymin=-1.1, ymax=1.1):
    """Deterministic params, PyTorch-Linear-style init (U(-1/sqrt(fan_in), ..)).
    Weights stored as (fan_in, fan_out) so ref_forward computes x @ W + b."""
    H, L = hidden_size, num_hidden_layers
    keys = jax.random.split(key, 2 * (L + 2))
    ki = iter(keys)

    def linear(fan_in, fan_out):
        bound = float(fan_in) ** -0.5
        W = jax.random.uniform(next(ki), (fan_in, fan_out), jnp.float32, -bound, bound)
        b = jax.random.uniform(next(ki), (fan_out,), jnp.float32, -bound, bound)
        return W, b

    Win, bin_ = linear(init_size, H)
    Wh, bh = [], []
    for i in range(L):
        in_size = H + init_size if i == 0 else 2 * H + init_size
        W, b = linear(in_size, H)
        Wh.append(W); bh.append(b)
    Wo, bo = linear(2 * H + init_size, 1)

    # CenteredLinearMap with default args (x_size=y_size=None): m=[1,1]
    m = jnp.array([[1.0, 1.0]], jnp.float32)
    b = jnp.array([[-(xmin + xmax) / 2.0, -(ymin + ymax) / 2.0]], jnp.float32)
    return dict(m=m, b=b, Win=Win, bin=bin_, Wh=Wh, bh=bh, Wo=Wo, bo=bo)


def pack_params(ref):
    """Repack reference (concat-layout, x@W) params into the kernel's transposed,
    fused layout:
      wxb  ((L+1)*H+1 padded /8, 8): [W_x^T | bias | 0] rows for every layer
      w0c  (H, H):        hidden layer 0 cur-block, transposed
      wcp  (L-1, H, 2H):  hidden layer j>=1 fused [cur | prev] blocks, transposed
      wocp (8, 2H):       output layer [cur | prev] block (M padded to 8)
    """
    init, H = ref["Win"].shape
    L = len(ref["Wh"])
    k_aug = ((init + 1) + 7) // 8 * 8

    rows = [jnp.concatenate([ref["Win"].T, ref["bin"][:, None]], axis=1)]
    for j in range(L):
        W = ref["Wh"][j]
        rows.append(jnp.concatenate([W[-init:, :].T, ref["bh"][j][:, None]], axis=1))
    Wo = ref["Wo"]
    rows.append(jnp.concatenate([Wo[2 * H:, 0][None, :], ref["bo"][None, :]], axis=1))
    wxb = jnp.concatenate(rows, axis=0)                        # (R, init+1)
    R = wxb.shape[0]
    Rp = (R + 7) // 8 * 8
    wxb = jnp.pad(wxb, ((0, Rp - R), (0, k_aug - (init + 1))))

    w0c = ref["Wh"][0][:H, :].T                                # (H, H)
    if L > 1:
        wcp = jnp.stack([ref["Wh"][j][:2 * H, :].T for j in range(1, L)])
    else:
        wcp = jnp.zeros((1, H, 2 * H), jnp.float32)            # unused dummy

    wocp = jnp.zeros((8, 2 * H), jnp.float32).at[0].set(Wo[:2 * H, 0])

    m_aug = jnp.zeros((k_aug, 1), jnp.float32)
    m_aug = m_aug.at[:init, 0].set(ref["m"][0]).at[init, 0].set(1.0)
    b_aug = jnp.zeros((k_aug, 1), jnp.float32).at[:init, 0].set(ref["b"][0])

    return dict(m_aug=m_aug, b_aug=b_aug, wxb=wxb, w0c=w0c, wcp=wcp, wocp=wocp,
                num_hidden_layers=L)


def ref_forward(x, ref):
    """Pure-JAX mirror of the PyTorch SkipConn.forward (concat form, exact GELU)."""
    x = ref["m"] * x + ref["b"]
    cur = jax.nn.gelu(x @ ref["Win"] + ref["bin"], approximate=False)
    prev = jnp.zeros((x.shape[0], 0), jnp.float32)
    for W, b in zip(ref["Wh"], ref["bh"]):
        comb = jnp.concatenate([cur, prev, x], axis=1)
        prev = cur
        cur = jax.nn.gelu(comb @ W + b, approximate=False)
    comb = jnp.concatenate([cur, prev, x], axis=1)
    y = comb @ ref["Wo"] + ref["bo"]
    return (jnp.tanh(y) + 1.0) / 2.0


if __name__ == "__main__":
    HIDDEN, LAYERS, INIT, BATCH = 32, 3, 2, 1024

    key = jax.random.PRNGKey(0)
    kp, kx = jax.random.split(key)

    ref_p = init_ref_params(kp, HIDDEN, LAYERS, INIT)
    kern_p = pack_params(ref_p)
    x = jax.random.normal(kx, (BATCH, INIT), jnp.float32)

    out = skipconn_forward(x, kern_p)            # tile_b auto -> 512, grid=(2,)
    out = jax.block_until_ready(out)
    assert out.shape == (BATCH, 1)

    expected = ref_forward(x, ref_p)             # exact (erf) GELU, like torch.nn.GELU
    max_err = float(jnp.max(jnp.abs(out - expected)))
    assert max_err < 3e-2, f"mismatch vs reference, max abs err = {max_err}"

    print("KERNEL_OK")
</pallas_src>

<mosaic_0001>
module attributes {stable_mosaic.version = 11 : i64} {
  func.func @kernel(%arg0: i32, %arg1: memref<8x512xf32, #tpu.memory_space<vmem>>, %arg2: memref<8x1xf32, #tpu.memory_space<vmem>>, %arg3: memref<8x1xf32, #tpu.memory_space<vmem>>, %arg4: memref<136x8xf32, #tpu.memory_space<vmem>>, %arg5: memref<32x32xf32, #tpu.memory_space<vmem>>, %arg6: memref<2x32x64xf32, #tpu.memory_space<vmem>>, %arg7: memref<8x64xf32, #tpu.memory_space<vmem>>, %arg8: memref<1x512xf32, #tpu.memory_space<vmem>>, %arg9: memref<64x512xf32, #tpu.memory_space<vmem>>, %arg10: memref<136x512xf32, #tpu.memory_space<vmem>>) attributes {dimension_semantics = [#tpu.dimension_semantics<parallel>], iteration_bounds = array<i64: 2>, scalar_prefetch = 0 : i64, scratch_operands = 2 : i64, tpu.core_type = #tpu.core_type<tc>, window_params = [{transform_indices = @transform_0, window_bounds = array<i64: 8, 512>}, {pipeline_mode = #tpu.pipeline_mode<synchronous>, transform_indices = @transform_1, window_bounds = array<i64: 8, 1>}, {pipeline_mode = #tpu.pipeline_mode<synchronous>, transform_indices = @transform_2, window_bounds = array<i64: 8, 1>}, {pipeline_mode = #tpu.pipeline_mode<synchronous>, transform_indices = @transform_3, window_bounds = array<i64: 136, 8>}, {pipeline_mode = #tpu.pipeline_mode<synchronous>, transform_indices = @transform_4, window_bounds = array<i64: 32, 32>}, {pipeline_mode = #tpu.pipeline_mode<synchronous>, transform_indices = @transform_5, window_bounds = array<i64: 2, 32, 64>}, {pipeline_mode = #tpu.pipeline_mode<synchronous>, transform_indices = @transform_6, window_bounds = array<i64: 8, 64>}, {transform_indices = @transform_7, window_bounds = array<i64: 1, 512>}]} {
    %c0 = arith.constant 0 : index
    %c0_0 = arith.constant 0 : index
    %0 = vector.load %arg1[%c0, %c0_0] : memref<8x512xf32, #tpu.memory_space<vmem>>, vector<8x512xf32>
    %c0_1 = arith.constant 0 : index
    %c0_2 = arith.constant 0 : index
    %1 = vector.load %arg2[%c0_1, %c0_2] : memref<8x1xf32, #tpu.memory_space<vmem>>, vector<8x1xf32>
    %2 = vector.broadcast %1 : vector<8x1xf32> to vector<8x512xf32>
    %3 = arith.mulf %0, %2 : vector<8x512xf32>
    %c0_3 = arith.constant 0 : index
    %c0_4 = arith.constant 0 : index
    %4 = vector.load %arg3[%c0_3, %c0_4] : memref<8x1xf32, #tpu.memory_space<vmem>>, vector<8x1xf32>
    %5 = vector.broadcast %4 : vector<8x1xf32> to vector<8x512xf32>
    %6 = arith.addf %3, %5 : vector<8x512xf32>
    %c0_5 = arith.constant 0 : index
    %c0_6 = arith.constant 0 : index
    %7 = vector.load %arg4[%c0_5, %c0_6] : memref<136x8xf32, #tpu.memory_space<vmem>>, vector<136x8xf32>
    %cst = arith.constant dense<0.000000e+00> : vector<136x512xf32>
    %8 = tpu.matmul %7, %6, %cst {dimension_numbers = #tpu.dot_dimension_numbers<[1], [0], [0], [1], [0, 0, 1, 1], [], []>} : vector<136x8xf32>, vector<8x512xf32>, vector<136x512xf32> -> vector<136x512xf32>
    %c0_7 = arith.constant 0 : index
    %c0_8 = arith.constant 0 : index
    %9 = vector.load %arg10[%c0_7, %c0_8] : memref<136x512xf32, #tpu.memory_space<vmem>>, vector<136x512xf32>
    tpu.vector_store %arg10[%c0_7, %c0_8], %8 {strides = array<i32>} : memref<136x512xf32, #tpu.memory_space<vmem>>, vector<136x512xf32>,
    %c0_9 = arith.constant 0 : index
    %c0_10 = arith.constant 0 : index
    %10 = vector.load %arg10[%c0_9, %c0_10] : memref<136x512xf32, #tpu.memory_space<vmem>>, vector<32x512xf32>
    %cst_11 = arith.constant 5.000000e-01 : f32
    %11 = vector.broadcast %cst_11 : f32 to vector<32x512xf32>
    %12 = arith.mulf %11, %10 : vector<32x512xf32>
    %cst_12 = arith.constant 4.471500e-02 : f32
    %13 = vector.broadcast %cst_12 : f32 to vector<32x512xf32>
    %14 = arith.mulf %13, %10 : vector<32x512xf32>
    %15 = arith.mulf %14, %10 : vector<32x512xf32>
    %16 = arith.mulf %15, %10 : vector<32x512xf32>
    %17 = arith.addf %10, %16 : vector<32x512xf32>
    %cst_13 = arith.constant 0.797884583 : f32
    %18 = vector.broadcast %cst_13 : f32 to vector<32x512xf32>
    %19 = arith.mulf %18, %17 : vector<32x512xf32>
    %20 = math.tanh %19 : vector<32x512xf32>
    %cst_14 = arith.constant 1.000000e+00 : f32
    %21 = vector.broadcast %cst_14 : f32 to vector<32x512xf32>
    %22 = arith.addf %21, %20 : vector<32x512xf32>
    %23 = arith.mulf %12, %22 : vector<32x512xf32>
    %c0_15 = arith.constant 0 : index
    %c0_16 = arith.constant 0 : index
    %24 = vector.load %arg5[%c0_15, %c0_16] : memref<32x32xf32, #tpu.memory_space<vmem>>, vector<32x32xf32>
    %cst_17 = arith.constant dense<0.000000e+00> : vector<32x512xf32>
    %25 = tpu.matmul %24, %23, %cst_17 {dimension_numbers = #tpu.dot_dimension_numbers<[1], [0], [0], [1], [0, 0, 1, 1], [], []>} : vector<32x32xf32>, vector<32x512xf32>, vector<32x512xf32> -> vector<32x512xf32>
    %c32 = arith.constant 32 : index
    %c0_18 = arith.constant 0 : index
    %26 = vector.load %arg10[%c32, %c0_18] : memref<136x512xf32, #tpu.memory_space<vmem>>, vector<32x512xf32>
    %27 = arith.addf %25, %26 : vector<32x512xf32>
    %c32_19 = arith.constant 32 : index
    %c0_20 = arith.constant 0 : index
    %28 = vector.load %arg9[%c32_19, %c0_20] : memref<64x512xf32, #tpu.memory_space<vmem>>, vector<32x512xf32>
    tpu.vector_store %arg9[%c32_19, %c0_20], %23 {strides = array<i32>} : memref<64x512xf32, #tpu.memory_space<vmem>>, vector<32x512xf32>,
    %cst_21 = arith.constant 5.000000e-01 : f32
    %29 = vector.broadcast %cst_21 : f32 to vector<32x512xf32>
    %30 = arith.mulf %29, %27 : vector<32x512xf32>
    %cst_22 = arith.constant 4.471500e-02 : f32
    %31 = vector.broadcast %cst_22 : f32 to vector<32x512xf32>
    %32 = arith.mulf %31, %27 : vector<32x512xf32>
    %33 = arith.mulf %32, %27 : vector<32x512xf32>
    %34 = arith.mulf %33, %27 : vector<32x512xf32>
    %35 = arith.addf %27, %34 : vector<32x512xf32>
    %cst_23 = arith.constant 0.797884583 : f32
    %36 = vector.broadcast %cst_23 : f32 to vector<32x512xf32>
    %37 = arith.mulf %36, %35 : vector<32x512xf32>
    %38 = math.tanh %37 : vector<32x512xf32>
    %cst_24 = arith.constant 1.000000e+00 : f32
    %39 = vector.broadcast %cst_24 : f32 to vector<32x512xf32>
    %40 = arith.addf %39, %38 : vector<32x512xf32>
    %41 = arith.mulf %30, %40 : vector<32x512xf32>
    %c0_25 = arith.constant 0 : index
    %c0_26 = arith.constant 0 : index
    %42 = vector.load %arg9[%c0_25, %c0_26] : memref<64x512xf32, #tpu.memory_space<vmem>>, vector<32x512xf32>
    tpu.vector_store %arg9[%c0_25, %c0_26], %41 {strides = array<i32>} : memref<64x512xf32, #tpu.memory_space<vmem>>, vector<32x512xf32>,
    %c0_27 = arith.constant 0 : index
    %c0_28 = arith.constant 0 : index
    %c0_29 = arith.constant 0 : index
    %43 = vector.load %arg6[%c0_27, %c0_28, %c0_29] : memref<2x32x64xf32, #tpu.memory_space<vmem>>, vector<1x32x64xf32>
    %44 = vector.shape_cast %43 : vector<1x32x64xf32> to vector<32x64xf32>
    %c0_30 = arith.constant 0 : index
    %c0_31 = arith.constant 0 : index
    %45 = vector.load %arg9[%c0_30, %c0_31] : memref<64x512xf32, #tpu.memory_space<vmem>>, vector<64x512xf32>
    %cst_32 = arith.constant dense<0.000000e+00> : vector<32x512xf32>
    %46 = tpu.matmul %44, %45, %cst_32 {dimension_numbers = #tpu.dot_dimension_numbers<[1], [0], [0], [1], [0, 0, 1, 1], [], []>} : vector<32x64xf32>, vector<64x512xf32>, vector<32x512xf32> -> vector<32x512xf32>
    %c64 = arith.constant 64 : index
    %c0_33 = arith.constant 0 : index
    %47 = vector.load %arg10[%c64, %c0_33] : memref<136x512xf32, #tpu.memory_space<vmem>>, vector<32x512xf32>
    %48 = arith.addf %46, %47 : vector<32x512xf32>
    %c0_34 = arith.constant 0 : index
    %c0_35 = arith.constant 0 : index
    %49 = vector.load %arg9[%c0_34, %c0_35] : memref<64x512xf32, #tpu.memory_space<vmem>>, vector<32x512xf32>
    %c32_36 = arith.constant 32 : index
    %c0_37 = arith.constant 0 : index
    %50 = vector.load %arg9[%c32_36, %c0_37] : memref<64x512xf32, #tpu.memory_space<vmem>>, vector<32x512xf32>
    tpu.vector_store %arg9[%c32_36, %c0_37], %49 {strides = array<i32>} : memref<64x512xf32, #tpu.memory_space<vmem>>, vector<32x512xf32>,
    %cst_38 = arith.constant 5.000000e-01 : f32
    %51 = vector.broadcast %cst_38 : f32 to vector<32x512xf32>
    %52 = arith.mulf %51, %48 : vector<32x512xf32>
    %cst_39 = arith.constant 4.471500e-02 : f32
    %53 = vector.broadcast %cst_39 : f32 to vector<32x512xf32>
    %54 = arith.mulf %53, %48 : vector<32x512xf32>
    %55 = arith.mulf %54, %48 : vector<32x512xf32>
    %56 = arith.mulf %55, %48 : vector<32x512xf32>
    %57 = arith.addf %48, %56 : vector<32x512xf32>
    %cst_40 = arith.constant 0.797884583 : f32
    %58 = vector.broadcast %cst_40 : f32 to vector<32x512xf32>
    %59 = arith.mulf %58, %57 : vector<32x512xf32>
    %60 = math.tanh %59 : vector<32x512xf32>
    %cst_41 = arith.constant 1.000000e+00 : f32
    %61 = vector.broadcast %cst_41 : f32 to vector<32x512xf32>
    %62 = arith.addf %61, %60 : vector<32x512xf32>
    %63 = arith.mulf %52, %62 : vector<32x512xf32>
    %c0_42 = arith.constant 0 : index
    %c0_43 = arith.constant 0 : index
    %64 = vector.load %arg9[%c0_42, %c0_43] : memref<64x512xf32, #tpu.memory_space<vmem>>, vector<32x512xf32>
    tpu.vector_store %arg9[%c0_42, %c0_43], %63 {strides = array<i32>} : memref<64x512xf32, #tpu.memory_space<vmem>>, vector<32x512xf32>,
    %c1 = arith.constant 1 : index
    %c0_44 = arith.constant 0 : index
    %c0_45 = arith.constant 0 : index
    %65 = vector.load %arg6[%c1, %c0_44, %c0_45] : memref<2x32x64xf32, #tpu.memory_space<vmem>>, vector<1x32x64xf32>
    %66 = vector.shape_cast %65 : vector<1x32x64xf32> to vector<32x64xf32>
    %c0_46 = arith.constant 0 : index
    %c0_47 = arith.constant 0 : index
    %67 = vector.load %arg9[%c0_46, %c0_47] : memref<64x512xf32, #tpu.memory_space<vmem>>, vector<64x512xf32>
    %cst_48 = arith.constant dense<0.000000e+00> : vector<32x512xf32>
    %68 = tpu.matmul %66, %67, %cst_48 {dimension_numbers = #tpu.dot_dimension_numbers<[1], [0], [0], [1], [0, 0, 1, 1], [], []>} : vector<32x64xf32>, vector<64x512xf32>, vector<32x512xf32> -> vector<32x512xf32>
    %c96 = arith.constant 96 : index
    %c0_49 = arith.constant 0 : index
    %69 = vector.load %arg10[%c96, %c0_49] : memref<136x512xf32, #tpu.memory_space<vmem>>, vector<32x512xf32>
    %70 = arith.addf %68, %69 : vector<32x512xf32>
    %c0_50 = arith.constant 0 : index
    %c0_51 = arith.constant 0 : index
    %71 = vector.load %arg9[%c0_50, %c0_51] : memref<64x512xf32, #tpu.memory_space<vmem>>, vector<32x512xf32>
    %c32_52 = arith.constant 32 : index
    %c0_53 = arith.constant 0 : index
    %72 = vector.load %arg9[%c32_52, %c0_53] : memref<64x512xf32, #tpu.memory_space<vmem>>, vector<32x512xf32>
    tpu.vector_store %arg9[%c32_52, %c0_53], %71 {strides = array<i32>} : memref<64x512xf32, #tpu.memory_space<vmem>>, vector<32x512xf32>,
    %cst_54 = arith.constant 5.000000e-01 : f32
    %73 = vector.broadcast %cst_54 : f32 to vector<32x512xf32>
    %74 = arith.mulf %73, %70 : vector<32x512xf32>
    %cst_55 = arith.constant 4.471500e-02 : f32
    %75 = vector.broadcast %cst_55 : f32 to vector<32x512xf32>
    %76 = arith.mulf %75, %70 : vector<32x512xf32>
    %77 = arith.mulf %76, %70 : vector<32x512xf32>
    %78 = arith.mulf %77, %70 : vector<32x512xf32>
    %79 = arith.addf %70, %78 : vector<32x512xf32>
    %cst_56 = arith.constant 0.797884583 : f32
    %80 = vector.broadcast %cst_56 : f32 to vector<32x512xf32>
    %81 = arith.mulf %80, %79 : vector<32x512xf32>
    %82 = math.tanh %81 : vector<32x512xf32>
    %cst_57 = arith.constant 1.000000e+00 : f32
    %83 = vector.broadcast %cst_57 : f32 to vector<32x512xf32>
    %84 = arith.addf %83, %82 : vector<32x512xf32>
    %85 = arith.mulf %74, %84 : vector<32x512xf32>
    %c0_58 = arith.constant 0 : index
    %c0_59 = arith.constant 0 : index
    %86 = vector.load %arg9[%c0_58, %c0_59] : memref<64x512xf32, #tpu.memory_space<vmem>>, vector<32x512xf32>
    tpu.vector_store %arg9[%c0_58, %c0_59], %85 {strides = array<i32>} : memref<64x512xf32, #tpu.memory_space<vmem>>, vector<32x512xf32>,
    %c0_60 = arith.constant 0 : index
    %c0_61 = arith.constant 0 : index
    %87 = vector.load %arg7[%c0_60, %c0_61] : memref<8x64xf32, #tpu.memory_space<vmem>>, vector<8x64xf32>
    %c0_62 = arith.constant 0 : index
    %c0_63 = arith.constant 0 : index
    %88 = vector.load %arg9[%c0_62, %c0_63] : memref<64x512xf32, #tpu.memory_space<vmem>>, vector<64x512xf32>
    %cst_64 = arith.constant dense<0.000000e+00> : vector<8x512xf32>
    %89 = tpu.matmul %87, %88, %cst_64 {dimension_numbers = #tpu.dot_dimension_numbers<[1], [0], [0], [1], [0, 0, 1, 1], [], []>} : vector<8x64xf32>, vector<64x512xf32>, vector<8x512xf32> -> vector<8x512xf32>
    %90 = vector.extract_strided_slice %89 {offsets = [0, 0], sizes = [1, 512], strides = [1, 1]} : vector<8x512xf32> to vector<1x512xf32>
    %c128 = arith.constant 128 : index
    %c0_65 = arith.constant 0 : index
    %91 = vector.load %arg10[%c128, %c0_65] : memref<136x512xf32, #tpu.memory_space<vmem>>, vector<1x512xf32>
    %92 = arith.addf %90, %91 : vector<1x512xf32>
    %93 = math.tanh %92 : vector<1x512xf32>
    %cst_66 = arith.constant 1.000000e+00 : f32
    %94 = vector.broadcast %cst_66 : f32 to vector<1x512xf32>
    %95 = arith.addf %93, %94 : vector<1x512xf32>
    %cst_67 = arith.constant 5.000000e-01 : f32
    %96 = vector.broadcast %cst_67 : f32 to vector<1x512xf32>
    %97 = arith.mulf %95, %96 : vector<1x512xf32>
    %c0_68 = arith.constant 0 : index
    %c0_69 = arith.constant 0 : index
    %98 = vector.load %arg8[%c0_68, %c0_69] : memref<1x512xf32, #tpu.memory_space<vmem>>, vector<1x512xf32>
    tpu.vector_store %arg8[%c0_68, %c0_69], %97 {strides = array<i32>} : memref<1x512xf32, #tpu.memory_space<vmem>>, vector<1x512xf32>,
    return
  }
  func.func @transform_0(%arg0: i32) -> (i32, i32) {
    %c0_i32 = arith.constant 0 : i32
    %c0_i32_0 = arith.constant 0 : i32
    return %c0_i32, %arg0 : i32, i32
  }
  func.func @transform_1(%arg0: i32) -> (i32, i32) {
    %c0_i32 = arith.constant 0 : i32
    %c0_i32_0 = arith.constant 0 : i32
    %c0_i32_1 = arith.constant 0 : i32
    return %c0_i32, %c0_i32_0 : i32, i32
  }
  func.func @transform_2(%arg0: i32) -> (i32, i32) {
    %c0_i32 = arith.constant 0 : i32
    %c0_i32_0 = arith.constant 0 : i32
    %c0_i32_1 = arith.constant 0 : i32
    return %c0_i32, %c0_i32_0 : i32, i32
  }
  func.func @transform_3(%arg0: i32) -> (i32, i32) {
    %c0_i32 = arith.constant 0 : i32
    %c0_i32_0 = arith.constant 0 : i32
    %c0_i32_1 = arith.constant 0 : i32
    return %c0_i32, %c0_i32_0 : i32, i32
  }
  func.func @transform_4(%arg0: i32) -> (i32, i32) {
    %c0_i32 = arith.constant 0 : i32
    %c0_i32_0 = arith.constant 0 : i32
    %c0_i32_1 = arith.constant 0 : i32
    return %c0_i32, %c0_i32_0 : i32, i32
  }
  func.func @transform_5(%arg0: i32) -> (i32, i32, i32) {
    %c0_i32 = arith.constant 0 : i32
    %c0_i32_0 = arith.constant 0 : i32
    %c0_i32_1 = arith.constant 0 : i32
    %c0_i32_2 = arith.constant 0 : i32
    return %c0_i32, %c0_i32_0, %c0_i32_1 : i32, i32, i32
  }
  func.func @transform_6(%arg0: i32) -> (i32, i32) {
    %c0_i32 = arith.constant 0 : i32
    %c0_i32_0 = arith.constant 0 : i32
    %c0_i32_1 = arith.constant 0 : i32
    return %c0_i32, %c0_i32_0 : i32, i32
  }
  func.func @transform_7(%arg0: i32) -> (i32, i32) {
    %c0_i32 = arith.constant 0 : i32
    %c0_i32_0 = arith.constant 0 : i32
    return %c0_i32, %arg0 : i32, i32
  }
}

</mosaic_0001>

<bundles_post_ra>
// kernel: tpu_custom_call.1
= control target key start
LH: loop header
LB: loop body
LE: loop exit
PB: predicated region body
PF: predicated region fallthrough
CT: control target
= control target key end

     0   :  { %12 = vsyncpa [#allocation5], 0  ;;  %s3769_s0 = inlined_call_operand.vmem [shape: f32[8,1024], index: 0, kind: input, shape index: {}]   ;;  %s3770_s1 = inlined_call_operand.vmem [shape: f32[8,1], index: 1, kind: input, shape index: {}]   ;;  %s3771_s2 = inlined_call_operand.vmem [shape: f32[8,1], index: 2, kind: input, shape index: {}]   ;;  %s3772_s3 = inlined_call_operand.vmem [shape: f32[136,8], index: 3, kind: input, shape index: {}]   ;;  %s3773_s4 = inlined_call_operand.vmem [shape: f32[32,32], index: 4, kind: input, shape index: {}]   ;;  %s3774_s5 = inlined_call_operand.vmem [shape: f32[2,32,64], index: 5, kind: input, shape index: {}]   ;;  %s3775_s6 = inlined_call_operand.vmem [shape: f32[8,64], index: 6, kind: input, shape index: {}]   ;;  %s3776_s7 = inlined_call_operand.hbm [shape: f32[1,1024], index: 7, kind: output, shape index: {}]  }
   0x1   :  { %14 = vsyncpa [#allocation5 + $0x1], 0  ;;  %s2879_s24 = smov 0   ;;  %s2881_s25 = smov 0  }
   0x2   :  { %s2883_s26 = smov 0   ;;  %s2885_s27 = smov 0  }
   0x3 LB: > { %s2900_s28 = sadd.s32 4294967295, %s2833_s27   ;;  %s2517_s29 = sadd.s32 4294967294, %s2833_s27   ;;  %s2833_s27 = sphi %s2885_s27, %s3782_s27   ;;  %s2829_s26 = sphi %s2883_s26, %s3781_s26   ;;  %s2825_s25 = sphi %s2881_s25, %s3780_s25   ;;  %s2821_s24 = sphi %s2879_s24, %s3779_s24  }
   0x4   : > { %s2904_s30 = sadd.s32 1, %s2833_s27   ;;  %s179_s8 = sadd.s32 1, %s2829_s26 }
   0x5   : > { %s176_s9 = ssub.s32 %s2833_s27, %s2904_s30  ;;  %p189_p0 = scmp.ne.s32.totalorder %s2829_s26, %s2825_s25 }
   0x6   : > { %p177_p1 = scmp.eq.s32.totalorder %s176_s9, 0  ;;  %p190_p2 = scmp.eq.s32.totalorder %s2900_s28, 1 }
   0x7   : > { %p195_p3 = scmp.ne.s32.totalorder %s2825_s25, %s2821_s24  ;;  %p196_p4 = scmp.eq.s32.totalorder %s2517_s29, 1 }
   0x8   : > { %s2915_s10 = scalar_select %p177_p1, %s2829_s26, %s179_s8  }
   0x9   : > { %p2917_p5 = por %p190_p2, %p189_p0  ;;  %p2921_p6 = por %p196_p4, %p195_p3 }
   0xa   : > { %p2520_p7 = scmp.ge.s32.totalorder %s2833_s27, 1  ;;  %p241_p8 = scmp.lt.s32.totalorder %s2833_s27, 3 }
   0xc   : > { %p242_p9 = pnand %p2520_p7, %p241_p8 }
   0xd   : > { %s2522_s17 = sshll.u32 (!%p242_p9), %s2900_s28, 2  ;;  %s270_s9 = sand.u32 (!%p242_p9), 1, %s2825_s25  }
   0xe   : > { %245 = sbr.rel (%p242_p9) target bundleno = 1395 (0x573), region = 48  ;;  %p274_p10 = scmp.lt.s32.totalorder (!%p242_p9), %s2522_s17, 7 }
   0xf   : > { %s2521_s13 = sshll.u32 (!%p242_p9), %s270_s9, 2  ;;  %s2593_s14 = sshll.u32 (!%p242_p9), %s2900_s28, 6 }
  0x10   : > { %s272_s15 = scalar_lea.vmem (!%p242_p9), [#allocation4], %s2521_s13  ;;  %s2456_s19 = scalar_lea.hbm (!%p242_p9), %s3776_s7, %s2593_s14 }
  0x11   : > { %s2458_s16 = sshll.u32 (!%p242_p9), %s272_s15, 4  ;;  %s2444_s20 = scalar_lea.sflag (!%p242_p9), [#allocation5], %s270_s9  ;;  %s2459_s16 = int_to_ptr.vmem [resolvable:$true] %s2458_s16 }
  0x12   : > { %s2838_s22 = smov (!%p242_p9), [#allocation4]  }
  0x13   : > { %v284_v0 = vld [vmem:[%s3770_s1] sm:$0xff]  ;;  %v2835_v1 = vmov 0   ;;  %v2836_v3 = vmov 0.0   ;;  %s3784_s17 = smov (!%p274_p10, %s2522_s17), 7  ;;  %vm321_vm0 = vcmask 64512   ;;  %v305_v19 = vld [vmem:[%s3772_s3 + $0x8] sm:$0xff] }
  0x14   : > { %2636 = vset.pattern.permute.xlu0 %v2835_v1  ;;  %v294_v2 = vld [vmem:[%s3771_s2] sm:$0xff]  ;;  %437 = vmatprep.mubr.f32.mxu0 %v2836_v3  ;;  %s2523_s18 = sshll.u32 %s3784_s17, 3  ;;  %v306_v20 = vld [vmem:[%s3772_s3 + $0x10] sm:$0xff]  ;;  %v307_v21 = vld [vmem:[%s3772_s3 + $0x18] sm:$0xff]  ;;  %vm955_vm1 = vcmask 261120   ;;  %vm1374_vm2 = vcmask 523264  }
  0x15   : > { %287 = vperm.xlu0 %2636, %v284_v0   ;;  %604 = vmatprep.mubr.f32.mxu1 %v2836_v3  ;;  %s277_s21 = scalar_lea.vmem %s3769_s0, %s2523_s18  ;;  %v304_v18 = vld [vmem:[%s3772_s3] sm:$0xff]  ;;  %v309_v23 = vld [vmem:[%s3772_s3 + $0x28] sm:$0xff]  ;;  %v310_v24 = vld [vmem:[%s3772_s3 + $0x30] sm:$0xff]  ;;  %s2777_s23 = sshll.u32 %s2838_s22, 4  ;;  %s2778_s23 = int_to_ptr.vmem [resolvable:$false] %s2777_s23 }
  0x16   : > { %v281_v4 = vld [vmem:[%s277_s21 + $0x8] sm:$0xff]  ;;  %v283_v6 = vld [vmem:[%s277_s21 + $0x18] sm:$0xff]  ;;  %v280_v7 = vld [vmem:[%s277_s21] sm:$0xff]  ;;  %s2779_s28 = scalar_lea.vmem %s2778_s23, 128  ;;  %p2780_p0 = scmp.lt.s32.totalorder %s2459_s16, %s2778_s23 }
  0x17   : > { %v282_v8 = vld [vmem:[%s277_s21 + $0x10] sm:$0xff]  ;;  %v308_v22 = vld [vmem:[%s3772_s3 + $0x20] sm:$0xff]  ;;  %v311_v25 = vld [vmem:[%s3772_s3 + $0x38] sm:$0xff]  ;;  %s2773_s21 = scalar_lea.vmem %s2459_s16, 64 }
  0x18   : > { %v312_v26 = vld [vmem:[%s3772_s3 + $0x40] sm:$0xff]  ;;  %v313_v27 = vld [vmem:[%s3772_s3 + $0x48] sm:$0xff]  ;;  %v314_v28 = vld [vmem:[%s3772_s3 + $0x50] sm:$0xff]  ;;  %p2774_p11 = scmp.ne.s32.totalorder %s2459_s16, %s2773_s21  ;;  %p2781_p1 = scmp.lt.s32.totalorder %s2779_s28, %s2773_s21 }
  0x19   : > { %297 = vperm.xlu0 %2636, %v294_v2   ;;  %v315_v29 = vld [vmem:[%s3772_s3 + $0x58] sm:$0xff]  ;;  %v316_v30 = vld [vmem:[%s3772_s3 + $0x60] sm:$0xff]  ;;  %v317_v31 = vld [vmem:[%s3772_s3 + $0x68] sm:$0xff] }
  0x1a   : > { %v318_v32 = vld [vmem:[%s3772_s3 + $0x70] sm:$0xff]  ;;  %v319_v33 = vld [vmem:[%s3772_s3 + $0x78] sm:$0xff]  ;;  %v320_v34 = vld [vmem:[%s3772_s3 + $0x80] sm:$0xff]  ;;  %p2775_p12 = pnand %p2774_p11, %p2917_p5  ;;  %p2782_p2 = por %p2781_p1, %p2780_p0 }
  0x1c   : > { %p2776_p13 = pneg %p2775_p12 }
  0x1e   : > { %p2783_p3 = pnand %p2782_p2, %p2776_p13 }
  0x90   : > { %v288_v5 = vpop.permute.xlu0 %287 }
  0x91   : > { %v291_v9 = vmul.f32 %v288_v5, %v281_v4  ;;  %v293_v10 = vmul.f32 %v288_v5, %v283_v6  ;;  %v290_v11 = vmul.f32 %v288_v5, %v280_v7  ;;  %v292_v12 = vmul.f32 %v288_v5, %v282_v8 }
  0x94   : > { %v298_v13 = vpop.permute.xlu0 %297 }
  0x95   : > { %v301_v14 = vadd.f32 %v298_v13, %v291_v9  ;;  %v303_v15 = vadd.f32 %v298_v13, %v293_v10  ;;  %v300_v16 = vadd.f32 %v298_v13, %v290_v11  ;;  %v302_v17 = vadd.f32 %v298_v13, %v292_v12 }
  0x97   : > { %403 = vmatprep.subr.mxu0 %v301_v14  ;;  %570 = vmatprep.subr.mxu1 %v303_v15 }
  0x98   : > { %404 = vmatpush1.msra.mxu0 %v300_v16  ;;  %571 = vmatpush1.msra.mxu1 %v302_v17 }
  0x99   : > { %2524 = vmatmul.mubr.msk.f32.vlgmr.msra.gmra.mxu0 %vm321_vm0, %v304_v18  ;;  %2541 = vmatmul.mubr.msk.f32.vlgmr.msra.gmra.mxu1 %vm321_vm0, %v304_v18 }
  0x9a   : > { %443 = vmatprep.mubr.f32.mxu0 %v2836_v3  ;;  %610 = vmatprep.mubr.f32.mxu1 %v2836_v3 }
  0x9d   : > { %2525 = vmatmul.mubr.msk.f32.gmra.mxu0 %vm321_vm0, %v305_v19  ;;  %2542 = vmatmul.mubr.msk.f32.gmra.mxu1 %vm321_vm0, %v305_v19 }
  0x9e   : > { %449 = vmatprep.mubr.f32.mxu0 %v2836_v3  ;;  %616 = vmatprep.mubr.f32.mxu1 %v2836_v3 }
  0xa1   : > { %2526 = vmatmul.mubr.msk.f32.gmra.mxu0 %vm321_vm0, %v306_v20  ;;  %2543 = vmatmul.mubr.msk.f32.gmra.mxu1 %vm321_vm0, %v306_v20 }
  0xa2   : > { %455 = vmatprep.mubr.f32.mxu0 %v2836_v3  ;;  %622 = vmatprep.mubr.f32.mxu1 %v2836_v3 }
  0xa5   : > { %2527 = vmatmul.mubr.msk.f32.gmra.mxu0 %vm321_vm0, %v307_v21  ;;  %2544 = vmatmul.mubr.msk.f32.gmra.mxu1 %vm321_vm0, %v307_v21 }
  0xa6   : > { %461 = vmatprep.mubr.f32.mxu0 %v2836_v3  ;;  %628 = vmatprep.mubr.f32.mxu1 %v2836_v3 }
  0xa9   : > { %2528 = vmatmul.mubr.msk.f32.gmra.mxu0 %vm321_vm0, %v308_v22  ;;  %2545 = vmatmul.mubr.msk.f32.gmra.mxu1 %vm321_vm0, %v308_v22 }
  0xaa   : > { %467 = vmatprep.mubr.f32.mxu0 %v2836_v3  ;;  %634 = vmatprep.mubr.f32.mxu1 %v2836_v3 }
  0xad   : > { %2529 = vmatmul.mubr.msk.f32.gmra.mxu0 %vm321_vm0, %v309_v23  ;;  %2546 = vmatmul.mubr.msk.f32.gmra.mxu1 %vm321_vm0, %v309_v23 }
  0xae   : > { %473 = vmatprep.mubr.f32.mxu0 %v2836_v3  ;;  %640 = vmatprep.mubr.f32.mxu1 %v2836_v3 }
  0xb1   : > { %2530 = vmatmul.mubr.msk.f32.gmra.mxu0 %vm321_vm0, %v310_v24  ;;  %2547 = vmatmul.mubr.msk.f32.gmra.mxu1 %vm321_vm0, %v310_v24 }
  0xb2   : > { %479 = vmatprep.mubr.f32.mxu0 %v2836_v3  ;;  %646 = vmatprep.mubr.f32.mxu1 %v2836_v3 }
  0xb5   : > { %2531 = vmatmul.mubr.msk.f32.gmra.mxu0 %vm321_vm0, %v311_v25  ;;  %2548 = vmatmul.mubr.msk.f32.gmra.mxu1 %vm321_vm0, %v311_v25 }
  0xb6   : > { %485 = vmatprep.mubr.f32.mxu0 %v2836_v3  ;;  %652 = vmatprep.mubr.f32.mxu1 %v2836_v3 }
  0xb9   : > { %2532 = vmatmul.mubr.msk.f32.gmra.mxu0 %vm321_vm0, %v312_v26  ;;  %2549 = vmatmul.mubr.msk.f32.gmra.mxu1 %vm321_vm0, %v312_v26 }
  0xba   : > { %491 = vmatprep.mubr.f32.mxu0 %v2836_v3  ;;  %658 = vmatprep.mubr.f32.mxu1 %v2836_v3 }
  0xbd   : > { %2533 = vmatmul.mubr.msk.f32.gmra.mxu0 %vm321_vm0, %v313_v27  ;;  %2550 = vmatmul.mubr.msk.f32.gmra.mxu1 %vm321_vm0, %v313_v27 }
  0xbe   : > { %497 = vmatprep.mubr.f32.mxu0 %v2836_v3  ;;  %664 = vmatprep.mubr.f32.mxu1 %v2836_v3 }
  0xc1   : > { %2534 = vmatmul.mubr.msk.f32.gmra.mxu0 %vm321_vm0, %v314_v28  ;;  %2551 = vmatmul.mubr.msk.f32.gmra.mxu1 %vm321_vm0, %v314_v28 }
  0xc2   : > { %503 = vmatprep.mubr.f32.mxu0 %v2836_v3  ;;  %670 = vmatprep.mubr.f32.mxu1 %v2836_v3 }
  0xc5   : > { %2535 = vmatmul.mubr.msk.f32.gmra.mxu0 %vm321_vm0, %v315_v29  ;;  %2552 = vmatmul.mubr.msk.f32.gmra.mxu1 %vm321_vm0, %v315_v29 }
  0xc6   : > { %509 = vmatprep.mubr.f32.mxu0 %v2836_v3  ;;  %676 = vmatprep.mubr.f32.mxu1 %v2836_v3 }
  0xc9   : > { %2536 = vmatmul.mubr.msk.f32.gmra.mxu0 %vm321_vm0, %v316_v30  ;;  %2553 = vmatmul.mubr.msk.f32.gmra.mxu1 %vm321_vm0, %v316_v30 }
  0xca   : > { %515 = vmatprep.mubr.f32.mxu0 %v2836_v3  ;;  %682 = vmatprep.mubr.f32.mxu1 %v2836_v3 }
  0xcd   : > { %2537 = vmatmul.mubr.msk.f32.gmra.mxu0 %vm321_vm0, %v317_v31  ;;  %2554 = vmatmul.mubr.msk.f32.gmra.mxu1 %vm321_vm0, %v317_v31 }
  0xce   : > { %521 = vmatprep.mubr.f32.mxu0 %v2836_v3  ;;  %688 = vmatprep.mubr.f32.mxu1 %v2836_v3 }
  0xd1   : > { %2538 = vmatmul.mubr.msk.f32.gmra.mxu0 %vm321_vm0, %v318_v32  ;;  %2555 = vmatmul.mubr.msk.f32.gmra.mxu1 %vm321_vm0, %v318_v32 }
  0xd2   : > { %527 = vmatprep.mubr.f32.mxu0 %v2836_v3  ;;  %694 = vmatprep.mubr.f32.mxu1 %v2836_v3 }
  0xd5   : > { %2539 = vmatmul.mubr.msk.f32.gmra.mxu0 %vm321_vm0, %v319_v33  ;;  %2556 = vmatmul.mubr.msk.f32.gmra.mxu1 %vm321_vm0, %v319_v33 }
  0xd6   : > { %533 = vmatprep.mubr.f32.mxu0 %v2836_v3  ;;  %700 = vmatprep.mubr.f32.mxu1 %v2836_v3 }
  0xd9   : > { %2540 = vmatmul.mubr.msk.f32.gmra.mxu0 %vm321_vm0, %v320_v34  ;;  %2557 = vmatmul.mubr.msk.f32.gmra.mxu1 %vm321_vm0, %v320_v34 }
  0xda   : > { %1032 = vmatprep.mubr.f32.mxu0 %v2836_v3  ;;  %1121 = vmatprep.mubr.f32.mxu1 %v2836_v3 }
 0x159   : > { %v3058_v35 = vpop.f32.mrf.mxu0  ;;  %v3060_v36 = vpop.f32.mrf.mxu1 }
 0x15a   : > { %v807_v39 = vmul.f32 0.044715, %v3058_v35  ;;  %v809_v43 = vmul.f32 0.044715, %v3060_v36 }
 0x15b   : > { %v3062_v37 = vpop.f32.mrf.mxu0  ;;  %v3064_v38 = vpop.f32.mrf.mxu1 }
 0x15c   : > { %v808_v42 = vmul.f32 0.044715, %v3062_v37  ;;  %v810_v48 = vmul.f32 0.044715, %v3064_v38  ;;  %v823_v50 = vmul.f32 %v807_v39, %v3058_v35  ;;  %v825_v54 = vmul.f32 %v809_v43, %v3060_v36 }
 0x15d   : > { %v3067_v40 = vpop.f32.mrf.mxu0  ;;  %v3069_v41 = vpop.f32.mrf.mxu1 }
 0x15e   : > { %v811_v44 = vmul.f32 0.044715, %v3067_v40  ;;  %v813_v47 = vmul.f32 0.044715, %v3069_v41  ;;  %v824_v53 = vmul.f32 %v808_v42, %v3062_v37  ;;  %v826_v62 = vmul.f32 %v810_v48, %v3064_v38 }
 0x15f   : > { %v3074_v45 = vpop.f32.mrf.mxu0  ;;  %v3076_v46 = vpop.f32.mrf.mxu1  ;;  %v3102_v2 = vmul.f32 %v823_v50, %v3058_v35  ;;  %v841_v9 = vmul.f32 %v825_v54, %v3060_v36 }
 0x160   : > { %v812_v49 = vmul.f32 0.044715, %v3074_v45  ;;  %v814_v57 = vmul.f32 0.044715, %v3076_v46  ;;  %v827_v58 = vmul.f32 %v811_v44, %v3067_v40  ;;  %v829_v61 = vmul.f32 %v813_v47, %v3069_v41 }
 0x161   : > { %v3082_v51 = vpop.f32.mrf.mxu0  ;;  %v3084_v52 = vpop.f32.mrf.mxu1  ;;  %v840_v8 = vmul.f32 %v824_v53, %v3062_v37 }
 0x162   : > { %v815_v55 = vmul.f32 0.044715, %v3082_v51  ;;  %v817_v56 = vmul.f32 0.044715, %v3084_v52  ;;  %v828_v1 = vmul.f32 %v812_v49, %v3074_v45  ;;  %v830_v12 = vmul.f32 %v814_v57, %v3076_v46 }
 0x163   : > { %v3092_v59 = vpop.f32.mrf.mxu0  ;;  %v3094_v60 = vpop.f32.mrf.mxu1  ;;  %v843_v13 = vmul.f32 %v827_v58, %v3067_v40  ;;  %v845_v19 = vmul.f32 %v829_v61, %v3069_v41  ;;  %v842_v61 = vmul.f32 %v826_v62, %v3064_v38 }
 0x164   : > { %v816_v63 = vmul.f32 0.044715, %v3092_v59  ;;  %v818_v0 = vmul.f32 0.044715, %v3094_v60  ;;  %v831_v6 = vmul.f32 %v815_v55, %v3082_v51  ;;  %v833_v7 = vmul.f32 %v817_v56, %v3084_v52 }
 0x165   : > { %v3104_v4 = vpop.f32.mrf.mxu0  ;;  %v3106_v5 = vpop.f32.mrf.mxu1  ;;  %v844_v23 = vmul.f32 %v828_v1, %v3074_v45  ;;  %v846_v31 = vmul.f32 %v830_v12, %v3076_v46  ;;  %v856_v12 = vadd.f32 %v840_v8, %v3062_v37 }
 0x166   : > { %v819_v10 = vmul.f32 0.044715, %v3104_v4  ;;  %v821_v11 = vmul.f32 0.044715, %v3106_v5  ;;  %v832_v16 = vmul.f32 %v816_v63, %v3092_v59  ;;  %v834_v17 = vmul.f32 %v818_v0, %v3094_v60 }
 0x167   : > { %v3116_v14 = vpop.f32.mrf.mxu0  ;;  %v3118_v15 = vpop.f32.mrf.mxu1  ;;  %v847_v18 = vmul.f32 %v831_v6, %v3082_v51  ;;  %v849_v22 = vmul.f32 %v833_v7, %v3084_v52  ;;  %v860_v56 = vadd.f32 %v844_v23, %v3074_v45  ;;  %v862_v58 = vadd.f32 %v846_v31, %v3076_v46 }
 0x168   : > { %v820_v20 = vmul.f32 0.044715, %v3116_v14  ;;  %v822_v21 = vmul.f32 0.044715, %v3118_v15  ;;  %v835_v24 = vmul.f32 %v819_v10, %v3104_v4  ;;  %v837_v25 = vmul.f32 %v821_v11, %v3106_v5 }
 0x169   : > { %v848_v26 = vmul.f32 %v832_v16, %v3092_v59  ;;  %v850_v27 = vmul.f32 %v834_v17, %v3094_v60  ;;  %v863_v30 = vadd.f32 %v847_v18, %v3082_v51  ;;  %v865_v47 = vadd.f32 %v849_v22, %v3084_v52 }
 0x16a   : > { %v836_v28 = vmul.f32 %v820_v20, %v3116_v14  ;;  %v838_v29 = vmul.f32 %v822_v21, %v3118_v15  ;;  %v851_v32 = vmul.f32 %v835_v24, %v3104_v4  ;;  %v853_v33 = vmul.f32 %v837_v25, %v3106_v5 }
 0x16b   : > { %v864_v34 = vadd.f32 %v848_v26, %v3092_v59  ;;  %v866_v39 = vadd.f32 %v850_v27, %v3094_v60  ;;  %v879_v44 = vmul.f32 0.7978846, %v863_v30  ;;  %v881_v6 = vmul.f32 0.7978846, %v865_v47 }
 0x16c   : > { %v852_v42 = vmul.f32 %v836_v28, %v3116_v14  ;;  %v854_v43 = vmul.f32 %v838_v29, %v3118_v15  ;;  %v867_v48 = vadd.f32 %v851_v32, %v3104_v4  ;;  %v869_v49 = vadd.f32 %v853_v33, %v3106_v5 }
 0x16d   : > { %v880_v50 = vmul.f32 0.7978846, %v864_v34  ;;  %v882_v53 = vmul.f32 0.7978846, %v866_v39  ;;  %2637 = vtanh.f32 %v879_v44  ;;  %v859_v7 = vadd.f32 %v843_v13, %v3067_v40 }
 0x16e   : > { %v868_v54 = vadd.f32 %v852_v42, %v3116_v14  ;;  %v870_v55 = vadd.f32 %v854_v43, %v3118_v15  ;;  %v883_v57 = vmul.f32 0.7978846, %v867_v48  ;;  %v885_v1 = vmul.f32 0.7978846, %v869_v49 }
 0x16f   : > { %2639 = vtanh.f32 %v880_v50  ;;  %v861_v10 = vadd.f32 %v845_v19, %v3069_v41  ;;  %v876_v11 = vmul.f32 0.7978846, %v860_v56  ;;  %v878_v16 = vmul.f32 0.7978846, %v862_v58 }
 0x170   : > { %v884_v63 = vmul.f32 0.7978846, %v868_v54  ;;  %v886_v0 = vmul.f32 0.7978846, %v870_v55  ;;  %2641 = vtanh.f32 %v882_v53  ;;  %v858_v17 = vadd.f32 %v842_v61, %v3064_v38 }
 0x171   : > { %2643 = vtanh.f32 %v883_v57  ;;  %v875_v62 = vmul.f32 0.7978846, %v859_v7  ;;  %v855_v18 = vadd.f32 %v3102_v2, %v3058_v35  ;;  %v877_v20 = vmul.f32 0.7978846, %v861_v10 }
 0x172   : > { %2645 = vtanh.f32 %v884_v63  ;;  %v857_v21 = vadd.f32 %v841_v9, %v3060_v36  ;;  %v872_v13 = vmul.f32 0.7978846, %v856_v12  ;;  %v874_v19 = vmul.f32 0.7978846, %v858_v17 }
 0x173   : > { %2647 = vtanh.f32 %v886_v0  ;;  %v871_v22 = vmul.f32 0.7978846, %v855_v18  ;;  %v799_v9 = vmul.f32 0.5, %v3082_v51  ;;  %v796_v28 = vmul.f32 0.5, %v3074_v45 }
 0x174   : > { %2649 = vtanh.f32 %v885_v1  ;;  %v873_v8 = vmul.f32 0.7978846, %v857_v21  ;;  %v804_v30 = vmul.f32 0.5, %v3116_v14  ;;  %v803_v32 = vmul.f32 0.5, %v3104_v4 }
 0x175   : > { %2651 = vtanh.f32 %v881_v6  ;;  %v806_v39 = vmul.f32 0.5, %v3118_v15  ;;  %v805_v51 = vmul.f32 0.5, %v3106_v5  ;;  %v800_v45 = vmul.f32 0.5, %v3092_v59 }
 0x176   : > { %2653 = vtanh.f32 %v876_v11  ;;  %v802_v4 = vmul.f32 0.5, %v3094_v60  ;;  %v801_v57 = vmul.f32 0.5, %v3084_v52  ;;  %v798_v59 = vmul.f32 0.5, %v3076_v46 }
 0x177   : > { %2655 = vtanh.f32 %v878_v16  ;;  %v795_v7 = vmul.f32 0.5, %v3067_v40  ;;  %v797_v12 = vmul.f32 0.5, %v3069_v41  ;;  %v794_v40 = vmul.f32 0.5, %v3064_v38 }
 0x178   : > { %2657 = vtanh.f32 %v875_v62  ;;  %v792_v62 = vmul.f32 0.5, %v3062_v37 }
 0x179   : > { %2659 = vtanh.f32 %v877_v20 }
 0x17a   : > { %2661 = vtanh.f32 %v872_v13  ;;  %v2638_v23 = vpop.eup %2637 }
 0x17b   : > { %2663 = vtanh.f32 %v874_v19  ;;  %v911_v44 = vadd.f32 1.0, %v2638_v23 }
 0x17c   : > { %v2640_v24 = vpop.eup %2639  ;;  %2665 = vtanh.f32 %v871_v22 }
 0x17d   : > { %v2642_v25 = vpop.eup %2641  ;;  %2667 = vtanh.f32 %v873_v8  ;;  %v912_v33 = vadd.f32 1.0, %v2640_v24  ;;  %v927_v63 = vmul.f32 %v911_v44, %v799_v9  ;;  %v791_v8 = vmul.f32 0.5, %v3058_v35  ;;  %v936_v35 = vld [vmem:[%s3773_s4 + $0x8] sm:$0xff] }
 0x17e   : > { %v2644_v2 = vpop.eup %2643  ;;  %v914_v43 = vadd.f32 1.0, %v2642_v25  ;;  %v793_v24 = vmul.f32 0.5, %v3060_v36  ;;  %v3189_v36 = vpop.f32.mrf.mxu0 }
 0x17f   : > { %v2646_v26 = vpop.eup %2645  ;;  %v915_v27 = vadd.f32 1.0, %v2644_v2  ;;  %v928_v56 = vmul.f32 %v912_v33, %v800_v45  ;;  %v935_v2 = vld [vmem:[%s3773_s4] sm:$0xff] }
 0x180   : > { %v2648_v29 = vpop.eup %2647  ;;  %v916_v31 = vadd.f32 1.0, %v2646_v26  ;;  %v930_v5 = vmul.f32 %v914_v43, %v802_v4  ;;  %v3191_v26 = vpop.f32.mrf.mxu1 }
 0x181   : > { %v2650_v34 = vpop.eup %2649  ;;  %v918_v42 = vadd.f32 1.0, %v2648_v29  ;;  %v931_v53 = vmul.f32 %v915_v27, %v803_v32  ;;  %v937_v27 = vld [vmem:[%s3773_s4 + $0x10] sm:$0xff]  ;;  %v3196_v9 = vpop.f32.mrf.mxu0 }
 0x182   : > { %v2652_v47 = vpop.eup %2651  ;;  %v3162_v48 = vmul.f32 %v916_v31, %v804_v30  ;;  %v917_v49 = vadd.f32 1.0, %v2650_v34  ;;  %v938_v31 = vld [vmem:[%s3773_s4 + $0x18] sm:$0xff] }
 0x183   : > { %v2654_v50 = vpop.eup %2653  ;;  %v934_v14 = vmul.f32 %v918_v42, %v806_v39  ;;  %v913_v54 = vadd.f32 1.0, %v2652_v47  ;;  %v3202_v29 = vpop.f32.mrf.mxu0 }
 0x184   : > { %v2656_v55 = vpop.eup %2655  ;;  %992 = vmatprep.subr.mxu0 %v3162_v48  ;;  %v933_v15 = vmul.f32 %v917_v49, %v805_v51  ;;  %v908_v58 = vadd.f32 1.0, %v2654_v50 }
 0x185   : > { %v2658_v61 = vpop.eup %2657  ;;  %1081 = vmatprep.subr.mxu1 %v934_v14  ;;  %993 = vmatpush1.msra.mxu0 %v931_v53  ;;  %v910_v0 = vadd.f32 1.0, %v2656_v55  ;;  %v929_v60 = vmul.f32 %v913_v54, %v801_v57  ;;  %v3212_v32 = vpop.f32.mrf.mxu0 }
 0x186   : > { %v2660_v1 = vpop.eup %2659  ;;  %1082 = vmatpush1.msra.mxu1 %v933_v15  ;;  %994 = vmatprep.subr.mxu0 %v928_v56  ;;  %v924_v6 = vmul.f32 %v908_v58, %v796_v28  ;;  %v907_v10 = vadd.f32 1.0, %v2658_v61  ;;  %v3198_v28 = vpop.f32.mrf.mxu1 }
 0x187   : > { %v2662_v11 = vpop.eup %2661  ;;  %1083 = vmatprep.subr.mxu1 %v930_v5  ;;  %995 = vmatpush1.msra.mxu0 %v927_v63  ;;  %v926_v52 = vmul.f32 %v910_v0, %v798_v59  ;;  %v909_v16 = vadd.f32 1.0, %v2660_v1  ;;  %v3217_v34 = vpop.f32.mrf.mxu0 }
 0x188   : > { %v2664_v17 = vpop.eup %2663  ;;  %1084 = vmatpush1.msra.mxu1 %v929_v60  ;;  %996 = vmatprep.subr.mxu0 %v924_v6  ;;  %v923_v46 = vmul.f32 %v907_v10, %v795_v7  ;;  %v904_v18 = vadd.f32 1.0, %v2662_v11  ;;  %v3204_v30 = vpop.f32.mrf.mxu1 }
 0x189   : > { %v2666_v20 = vpop.eup %2665  ;;  %1085 = vmatprep.subr.mxu1 %v926_v52  ;;  %v925_v21 = vmul.f32 %v909_v16, %v797_v12  ;;  %v906_v13 = vadd.f32 1.0, %v2664_v17  ;;  %v3223_v42 = vpop.f32.mrf.mxu0 }
 0x18a   : > { %v2668_v19 = vpop.eup %2667  ;;  %997 = vmatpush1.msra.mxu0 %v923_v46  ;;  %v920_v22 = vmul.f32 %v904_v18, %v792_v62  ;;  %v903_v41 = vadd.f32 1.0, %v2666_v20  ;;  %v3214_v33 = vpop.f32.mrf.mxu1 }
 0x18b   : > { %1086 = vmatpush1.msra.mxu1 %v925_v21  ;;  %v922_v23 = vmul.f32 %v906_v13, %v794_v40  ;;  %v905_v25 = vadd.f32 1.0, %v2668_v19  ;;  %v3229_v44 = vpop.f32.mrf.mxu0 }
 0x18c   : > { %998 = vmatprep.subr.mxu0 %v920_v22  ;;  %v919_v37 = vmul.f32 %v903_v41, %v791_v8  ;;  %v3219_v39 = vpop.f32.mrf.mxu1 }
 0x18d   : > { %1087 = vmatprep.subr.mxu1 %v922_v23  ;;  %v921_v38 = vmul.f32 %v905_v25, %v793_v24 }
 0x18e   : > { %999 = vmatpush1.msra.mxu0 %v919_v37  ;;  %v3225_v43 = vpop.f32.mrf.mxu1 }
 0x18f   : > { %1088 = vmatpush1.msra.mxu1 %v921_v38  ;;  %2558 = vmatmul.mubr.msk.f32.vlgmr.msra.gmra.mxu0 %vm955_vm1, %v935_v2 }
 0x190   : > { %2562 = vmatmul.mubr.msk.f32.vlgmr.msra.gmra.mxu1 %vm955_vm1, %v935_v2  ;;  %1403 = vmatprep.subr.mxu0 %v3162_v48  ;;  %v3231_v47 = vpop.f32.mrf.mxu1  ;;  %v3233_v48 = vpop.f32.mrf.mxu0 }
 0x191   : > { %1492 = vmatprep.subr.mxu1 %v934_v14  ;;  %1404 = vmatpush1.msra.mxu0 %v931_v53 }
 0x192   : > { %1493 = vmatpush1.msra.mxu1 %v933_v15  ;;  %1405 = vmatprep.subr.mxu0 %v928_v56  ;;  %v3235_v51 = vpop.f32.mrf.mxu1  ;;  %v3237_v49 = vpop.f32.mrf.mxu0 }
 0x193   : > { %1494 = vmatprep.subr.mxu1 %v930_v5  ;;  %1038 = vmatprep.mubr.f32.mxu0 %v2836_v3 }
 0x194   : > { %1127 = vmatprep.mubr.f32.mxu1 %v2836_v3  ;;  %1406 = vmatpush1.msra.mxu0 %v927_v63  ;;  %v3239_v45 = vpop.f32.mrf.mxu1  ;;  %v3241_v50 = vpop.f32.mrf.mxu0 }
 0x195   : > { %1495 = vmatpush1.msra.mxu1 %v929_v60  ;;  %2559 = vmatmul.mubr.msk.f32.gmra.mxu0 %vm955_vm1, %v936_v35 }
 0x196   : > { %2563 = vmatmul.mubr.msk.f32.gmra.mxu1 %vm955_vm1, %v936_v35  ;;  %1407 = vmatprep.subr.mxu0 %v924_v6  ;;  %v3243_v14 = vpop.f32.mrf.mxu1  ;;  %v3245_v53 = vpop.f32.mrf.mxu0 }
 0x197   : > { %1496 = vmatprep.subr.mxu1 %v926_v52  ;;  %1408 = vmatpush1.msra.mxu0 %v923_v46 }
 0x198   : > { %1497 = vmatpush1.msra.mxu1 %v925_v21  ;;  %1409 = vmatprep.subr.mxu0 %v920_v22  ;;  %v3247_v4 = vpop.f32.mrf.mxu1  ;;  %v3249_v54 = vpop.f32.mrf.mxu0 }
 0x199   : > { %1498 = vmatprep.subr.mxu1 %v922_v23  ;;  %1044 = vmatprep.mubr.f32.mxu0 %v2836_v3 }
 0x19a   : > { %1133 = vmatprep.mubr.f32.mxu1 %v2836_v3  ;;  %1410 = vmatpush1.msra.mxu0 %v919_v37  ;;  %v3251_v55 = vpop.f32.mrf.mxu1  ;;  %v3253_v15 = vpop.f32.mrf.mxu0 }
 0x19b   : > { %1499 = vmatpush1.msra.mxu1 %v921_v38  ;;  %2560 = vmatmul.mubr.msk.f32.gmra.mxu0 %vm955_vm1, %v937_v27 }
 0x19c   : > { %2564 = vmatmul.mubr.msk.f32.gmra.mxu1 %vm955_vm1, %v937_v27  ;;  %1050 = vmatprep.mubr.f32.mxu0 %v2836_v3  ;;  %v3255_v56 = vpop.f32.mrf.mxu1  ;;  %v3257_v57 = vpop.f32.mrf.mxu0 }
 0x19d   : > { %1139 = vmatprep.mubr.f32.mxu1 %v2836_v3 }
 0x19e   : > { %v3259_v58 = vpop.f32.mrf.mxu1  ;;  %v3261_v61 = vpop.f32.mrf.mxu0 }
 0x19f   : > { %2561 = vmatmul.mubr.msk.f32.gmra.mxu0 %vm955_vm1, %v938_v31 }
 0x1a0   : > { %2565 = vmatmul.mubr.msk.f32.gmra.mxu1 %vm955_vm1, %v938_v31  ;;  %1451 = vmatprep.mubr.f32.mxu0 %v2836_v3  ;;  %v3263_v5 = vpop.f32.mrf.mxu1  ;;  %v3265_v63 = vpop.f32.mrf.mxu0 }
 0x1a1   : > { %1540 = vmatprep.mubr.f32.mxu1 %v2836_v3 }
 0x1a2   : > { %v3267_v59 = vpop.f32.mrf.mxu1  ;;  %v511_v0 = vpop.f32.mrf.mxu0 }
 0x1a3   : > { %755 = vst [vmem:[#allocation3 + $0x180] sm:$0xff] %v511_v0 }
 0x1a4   : > { %v678_v1 = vpop.f32.mrf.mxu1  ;;  %v513_v60 = vpop.f32.mrf.mxu0 }
 0x1a5   : > { %757 = vst [vmem:[#allocation3 + $0x190] sm:$0xff] %v678_v1  ;;  %756 = vst [vmem:[#allocation3 + $0x188] sm:$0xff] %v513_v60 }
 0x1a6   : > { %v680_v6 = vpop.f32.mrf.mxu1  ;;  %v517_v7 = vpop.f32.mrf.mxu0 }
 0x1a7   : > { %758 = vst [vmem:[#allocation3 + $0x198] sm:$0xff] %v680_v6  ;;  %759 = vst [vmem:[#allocation3 + $0x1a0] sm:$0xff] %v517_v7 }
 0x1a8   : > { %v684_v10 = vpop.f32.mrf.mxu1  ;;  %v519_v11 = vpop.f32.mrf.mxu0 }
 0x1a9   : > { %761 = vst [vmem:[#allocation3 + $0x1b0] sm:$0xff] %v684_v10  ;;  %760 = vst [vmem:[#allocation3 + $0x1a8] sm:$0xff] %v519_v11 }
 0x1aa   : > { %v686_v52 = vpop.f32.mrf.mxu1  ;;  %v523_v12 = vpop.f32.mrf.mxu0 }
 0x1ab   : > { %762 = vst [vmem:[#allocation3 + $0x1b8] sm:$0xff] %v686_v52  ;;  %763 = vst [vmem:[#allocation3 + $0x1c0] sm:$0xff] %v523_v12 }
 0x1ac   : > { %v690_v16 = vpop.f32.mrf.mxu1  ;;  %v525_v17 = vpop.f32.mrf.mxu0 }
 0x1ad   : > { %765 = vst [vmem:[#allocation3 + $0x1d0] sm:$0xff] %v690_v16  ;;  %764 = vst [vmem:[#allocation3 + $0x1c8] sm:$0xff] %v525_v17 }
 0x1ae   : > { %v692_v46 = vpop.f32.mrf.mxu1  ;;  %v529_v62 = vpop.f32.mrf.mxu0 }
 0x1af   : > { %766 = vst [vmem:[#allocation3 + $0x1d8] sm:$0xff] %v692_v46  ;;  %767 = vst [vmem:[#allocation3 + $0x1e0] sm:$0xff] %v529_v62 }
 0x1b0   : > { %v696_v18 = vpop.f32.mrf.mxu1  ;;  %v531_v20 = vpop.f32.mrf.mxu0 }
 0x1b1   : > { %769 = vst [vmem:[#allocation3 + $0x1f0] sm:$0xff] %v696_v18  ;;  %768 = vst [vmem:[#allocation3 + $0x1e8] sm:$0xff] %v531_v20 }
 0x1b2   : > { %v698_v21 = vpop.f32.mrf.mxu1  ;;  %v535_v40 = vpop.f32.mrf.mxu0 }
 0x1b3   : > { %770 = vst [vmem:[#allocation3 + $0x1f8] sm:$0xff] %v698_v21  ;;  %771 = vst [vmem:[#allocation3 + $0x200] sm:$0xff] %v535_v40 }
 0x1b4   : > { %v702_v13 = vpop.f32.mrf.mxu1  ;;  %v537_v19 = vpop.f32.mrf.mxu0 }
 0x1b5   : > { %773 = vst [vmem:[#allocation3 + $0x210] sm:$0xff] %v702_v13  ;;  %772 = vst [vmem:[#allocation3 + $0x208] sm:$0xff] %v537_v19 }
 0x1b6   : > { %v704_v22 = vpop.f32.mrf.mxu1 }
 0x1b7   : > { %774 = vst [vmem:[#allocation3 + $0x218] sm:$0xff] %v704_v22 }
 0x24f   : > { %v1034_v8 = vpop.f32.mrf.mxu0 }
 0x250   : > { %v1123_v41 = vpop.f32.mrf.mxu1  ;;  %v3270_v23 = vadd.f32 %v1034_v8, %v3189_v36 }
 0x251   : > { %v1036_v24 = vpop.f32.mrf.mxu0  ;;  %v3273_v25 = vadd.f32 %v1123_v41, %v3191_v26 }
 0x252   : > { %v1125_v37 = vpop.f32.mrf.mxu1  ;;  %v3276_v2 = vadd.f32 %v1036_v24, %v3196_v9  ;;  %v1178_v38 = vmul.f32 0.044715, %v3270_v23 }
 0x253   : > { %v1180_v27 = vmul.f32 0.044715, %v3273_v25  ;;  %v3281_v31 = vadd.f32 %v1125_v37, %v3198_v28 }
 0x254   : > { %v1179_v26 = vmul.f32 0.044715, %v3276_v2  ;;  %v1194_v6 = vmul.f32 %v1178_v38, %v3270_v23 }
 0x255   : > { %v1040_v35 = vpop.f32.mrf.mxu0  ;;  %v1196_v7 = vmul.f32 %v1180_v27, %v3273_v25  ;;  %v1181_v10 = vmul.f32 0.044715, %v3281_v31 }
 0x256   : > { %v1129_v0 = vpop.f32.mrf.mxu1  ;;  %v3284_v36 = vadd.f32 %v1040_v35, %v3202_v29  ;;  %v1195_v52 = vmul.f32 %v1179_v26, %v3276_v2  ;;  %v3302_v17 = vmul.f32 %v1194_v6, %v3270_v23 }
 0x257   : > { %v1042_v1 = vpop.f32.mrf.mxu0  ;;  %v3289_v9 = vadd.f32 %v1129_v0, %v3204_v30  ;;  %v3312_v18 = vmul.f32 %v1196_v7, %v3273_v25  ;;  %v1197_v20 = vmul.f32 %v1181_v10, %v3281_v31 }
 0x258   : > { %v1131_v60 = vpop.f32.mrf.mxu1  ;;  %v1182_v28 = vmul.f32 0.044715, %v3284_v36  ;;  %v3295_v11 = vadd.f32 %v1042_v1, %v3212_v32  ;;  %v1211_v37 = vmul.f32 %v1195_v52, %v3276_v2 }
 0x259   : > { %v1184_v30 = vmul.f32 0.044715, %v3289_v9  ;;  %v3306_v46 = vadd.f32 %v1131_v60, %v3214_v33 }
 0x25a   : > { %v1198_v13 = vmul.f32 %v1182_v28, %v3284_v36  ;;  %v1183_v33 = vmul.f32 0.044715, %v3295_v11 }
 0x25b   : > { %v1046_v29 = vpop.f32.mrf.mxu0  ;;  %v1200_v38 = vmul.f32 %v1184_v30, %v3289_v9  ;;  %v1185_v35 = vmul.f32 0.044715, %v3306_v46  ;;  %v1213_v30 = vmul.f32 %v1197_v20, %v3281_v31 }
 0x25c   : > { %v3299_v12 = vadd.f32 %v1046_v29, %v3217_v34  ;;  %v1135_v16 = vpop.f32.mrf.mxu1 }
 0x25d   : > { %v3309_v62 = vadd.f32 %v1135_v16, %v3219_v39  ;;  %v1048_v32 = vpop.f32.mrf.mxu0 }
 0x25e   : > { %v1186_v34 = vmul.f32 0.044715, %v3299_v12  ;;  %v3317_v21 = vadd.f32 %v1048_v32, %v3223_v42  ;;  %v1137_v40 = vpop.f32.mrf.mxu1  ;;  %v1199_v32 = vmul.f32 %v1183_v33, %v3295_v11 }
 0x25f   : > { %v1188_v19 = vmul.f32 0.044715, %v3309_v62  ;;  %v3323_v39 = vadd.f32 %v1137_v40, %v3225_v43  ;;  %v1052_v22 = vpop.f32.mrf.mxu0 }
 0x260   : > { %v1202_v8 = vmul.f32 %v1186_v34, %v3299_v12  ;;  %v1187_v41 = vmul.f32 0.044715, %v3317_v21  ;;  %v3328_v24 = vadd.f32 %v1052_v22, %v3229_v44  ;;  %v1141_v42 = vpop.f32.mrf.mxu1 }
 0x261   : > { %v1189_v27 = vmul.f32 0.044715, %v3323_v39  ;;  %v3335_v43 = vadd.f32 %v1141_v42, %v3231_v47  ;;  %v1054_v0 = vpop.f32.mrf.mxu0  ;;  %v1204_v26 = vmul.f32 %v1188_v19, %v3309_v62  ;;  %v1216_v19 = vmul.f32 %v1200_v38, %v3289_v9 }
 0x262   : > { %v1218_v1 = vmul.f32 %v1202_v8, %v3299_v12  ;;  %v1190_v44 = vmul.f32 0.044715, %v3328_v24  ;;  %v3341_v60 = vadd.f32 %v1054_v0, %v3233_v48  ;;  %v1143_v6 = vpop.f32.mrf.mxu1  ;;  %v1203_v7 = vmul.f32 %v1187_v41, %v3317_v21 }
 0x263   : > { %v1205_v10 = vmul.f32 %v1189_v27, %v3323_v39  ;;  %v1192_v28 = vmul.f32 0.044715, %v3335_v43  ;;  %v3347_v47 = vadd.f32 %v1143_v6, %v3235_v51  ;;  %v1214_v48 = vmul.f32 %v1198_v13, %v3284_v36 }
 0x264   : > { %v1234_v29 = vadd.f32 %v1218_v1, %v3299_v12  ;;  %v1206_v52 = vmul.f32 %v1190_v44, %v3328_v24  ;;  %v1191_v16 = vmul.f32 0.044715, %v3341_v60  ;;  %v1220_v51 = vmul.f32 %v1204_v26, %v3309_v62 }
 0x265   : > { %v1208_v34 = vmul.f32 %v1192_v28, %v3335_v43  ;;  %v1193_v40 = vmul.f32 0.044715, %v3347_v47  ;;  %v1219_v13 = vmul.f32 %v1203_v7, %v3317_v21  ;;  %v1221_v33 = vmul.f32 %v1205_v10, %v3323_v39 }
 0x266   : > { %v1222_v22 = vmul.f32 %v1206_v52, %v3328_v24  ;;  %v1207_v8 = vmul.f32 %v1191_v16, %v3341_v60  ;;  %v1201_v42 = vmul.f32 %v1185_v35, %v3306_v46  ;;  %v1250_v0 = vmul.f32 0.7978846, %v1234_v29 }
 0x267   : > { %v1224_v41 = vmul.f32 %v1208_v34, %v3335_v43  ;;  %v1209_v20 = vmul.f32 %v1193_v40, %v3347_v47  ;;  %v1235_v44 = vadd.f32 %v1219_v13, %v3317_v21  ;;  %v1237_v6 = vadd.f32 %v1221_v33, %v3323_v39 }
 0x268   : > { %v1238_v27 = vadd.f32 %v1222_v22, %v3328_v24  ;;  %v1223_v38 = vmul.f32 %v1207_v8, %v3341_v60  ;;  %v1236_v28 = vadd.f32 %v1220_v51, %v3309_v62  ;;  %v1215_v35 = vmul.f32 %v1199_v32, %v3295_v11 }
 0x269   : > { %v1240_v1 = vadd.f32 %v1224_v41, %v3335_v43  ;;  %v1225_v26 = vmul.f32 %v1209_v20, %v3347_v47  ;;  %v1251_v34 = vmul.f32 0.7978846, %v1235_v44  ;;  %2669 = vtanh.f32 %v1250_v0 }
 0x26a   : > { %v1239_v7 = vadd.f32 %v1223_v38, %v3341_v60  ;;  %v1254_v10 = vmul.f32 0.7978846, %v1238_v27  ;;  %v1231_v40 = vadd.f32 %v1215_v35, %v3295_v11  ;;  %v1217_v22 = vmul.f32 %v1201_v42, %v3306_v46 }
 0x26b   : > { %v1241_v52 = vadd.f32 %v1225_v26, %v3347_v47  ;;  %v1256_v16 = vmul.f32 0.7978846, %v1240_v1  ;;  %v1230_v8 = vadd.f32 %v1214_v48, %v3284_v36  ;;  %v1253_v51 = vmul.f32 0.7978846, %v1237_v6 }
 0x26c   : > { %v1255_v29 = vmul.f32 0.7978846, %v1239_v7  ;;  %2671 = vtanh.f32 %v1254_v10  ;;  %v1232_v20 = vadd.f32 %v1216_v19, %v3289_v9  ;;  %v1252_v32 = vmul.f32 0.7978846, %v1236_v28 }
 0x26d   : > { %v1257_v41 = vmul.f32 0.7978846, %v1241_v52  ;;  %2673 = vtanh.f32 %v1256_v16  ;;  %v1233_v13 = vadd.f32 %v1217_v22, %v3306_v46  ;;  %v1247_v33 = vmul.f32 0.7978846, %v1231_v40 }
 0x26e   : > { %2675 = vtanh.f32 %v1255_v29  ;;  %v1227_v27 = vadd.f32 %v1211_v37, %v3276_v2  ;;  %v1229_v0 = vadd.f32 %v1213_v30, %v3281_v31  ;;  %v1226_v48 = vadd.f32 %v3302_v17, %v3270_v23 }
 0x26f   : > { %2677 = vtanh.f32 %v1257_v41  ;;  %v1249_v38 = vmul.f32 0.7978846, %v1233_v13  ;;  %v1246_v42 = vmul.f32 0.7978846, %v1230_v8  ;;  %v1228_v19 = vadd.f32 %v3312_v18, %v3273_v25 }
 0x270   : > { %2679 = vtanh.f32 %v1251_v34  ;;  %v1248_v1 = vmul.f32 0.7978846, %v1232_v20  ;;  %v1243_v26 = vmul.f32 0.7978846, %v1227_v27  ;;  %v1245_v44 = vmul.f32 0.7978846, %v1229_v0 }
 0x271   : > { %2681 = vtanh.f32 %v1253_v51  ;;  %v1242_v37 = vmul.f32 0.7978846, %v1226_v48  ;;  %v1244_v6 = vmul.f32 0.7978846, %v1228_v19  ;;  %v1175_v35 = vmul.f32 0.5, %v3341_v60 }
 0x272   : > { %2683 = vtanh.f32 %v1252_v32  ;;  %v1170_v34 = vmul.f32 0.5, %v3299_v12  ;;  %v1177_v40 = vmul.f32 0.5, %v3347_v47  ;;  %v1174_v8 = vmul.f32 0.5, %v3328_v24 }
 0x273   : > { %2685 = vtanh.f32 %v1247_v33  ;;  %v1176_v32 = vmul.f32 0.5, %v3335_v43  ;;  %v1171_v13 = vmul.f32 0.5, %v3317_v21  ;;  %v1173_v12 = vmul.f32 0.5, %v3323_v39 }
 0x274   : > { %2687 = vtanh.f32 %v1249_v38 }
 0x275   : > { %2689 = vtanh.f32 %v1246_v42  ;;  %v1172_v42 = vmul.f32 0.5, %v3309_v62 }
 0x276   : > { %2691 = vtanh.f32 %v1248_v1  ;;  %v2670_v30 = vpop.eup %2669 }
 0x277   : > { %2693 = vtanh.f32 %v1243_v26  ;;  %v1282_v41 = vadd.f32 1.0, %v2670_v30  ;;  %v1167_v26 = vmul.f32 0.5, %v3295_v11  ;;  %v1168_v11 = vmul.f32 0.5, %v3289_v9 }
 0x278   : > { %2695 = vtanh.f32 %v1245_v44 }
 0x279   : > { %v2672_v28 = vpop.eup %2671  ;;  %2697 = vtanh.f32 %v1242_v37  ;;  %v1298_v1 = vmul.f32 %v1282_v41, %v1170_v34  ;;  %v1163_v34 = vmul.f32 0.5, %v3276_v2 }
 0x27a   : > { %v2674_v17 = vpop.eup %2673  ;;  %2699 = vtanh.f32 %v1244_v6  ;;  %v1286_v10 = vadd.f32 1.0, %v2672_v28  ;;  %v1169_v6 = vmul.f32 0.5, %v3306_v46 }
 0x27b   : > { %v2676_v7 = vpop.eup %2675  ;;  %v1288_v16 = vadd.f32 1.0, %v2674_v17  ;;  %v1166_v17 = vmul.f32 0.5, %v3284_v36 }
 0x27c   : > { %v2678_v18 = vpop.eup %2677  ;;  %v1287_v52 = vadd.f32 1.0, %v2676_v7  ;;  %v3397_v38 = vmul.f32 %v1286_v10, %v1174_v8 }
 0x27d   : > { %v2680_v29 = vpop.eup %2679  ;;  %v1289_v22 = vadd.f32 1.0, %v2678_v18  ;;  %v1304_v24 = vmul.f32 %v1288_v16, %v1176_v32 }
 0x27e   : > { %v2682_v51 = vpop.eup %2681  ;;  %v3391_v20 = vmul.f32 %v1287_v52, %v1175_v35  ;;  %v1283_v33 = vadd.f32 1.0, %v2680_v29 }
 0x27f   : > { %v2684_v60 = vpop.eup %2683  ;;  %v3395_v27 = vmul.f32 %v1289_v22, %v1177_v40  ;;  %v1285_v47 = vadd.f32 1.0, %v2682_v51  ;;  %v1165_v22 = vmul.f32 0.5, %v3281_v31  ;;  %v1162_v51 = vmul.f32 0.5, %v3270_v23  ;;  %v1323_v23 = vld [vmem:[%s3774_s5 + $0x8] sm:$0xff] }
 0x280   : > { %v2686_v0 = vpop.eup %2685  ;;  %1411 = vmatprep.subr.mxu0 %v3391_v20  ;;  %v1299_v48 = vmul.f32 %v1283_v33, %v1171_v13  ;;  %v1284_v19 = vadd.f32 1.0, %v2684_v60  ;;  %v1164_v13 = vmul.f32 0.5, %v3273_v25  ;;  %v1322_v60 = vld [vmem:[%s3774_s5] sm:$0xff]  ;;  %v1324_v25 = vld [vmem:[%s3774_s5 + $0x10] sm:$0xff] }
 0x281   : > { %v2688_v43 = vpop.eup %2687  ;;  %1500 = vmatprep.subr.mxu1 %v3395_v27  ;;  %1412 = vmatpush1.msra.mxu0 %v3397_v38  ;;  %v1301_v21 = vmul.f32 %v1285_v47, %v1173_v12  ;;  %v1279_v44 = vadd.f32 1.0, %v2686_v0 }
 0x282   : > { %v2690_v39 = vpop.eup %2689  ;;  %1501 = vmatpush1.msra.mxu1 %v1304_v24  ;;  %1413 = vmatprep.subr.mxu0 %v1299_v48  ;;  %v1300_v37 = vmul.f32 %v1284_v19, %v1172_v42  ;;  %v1281_v30 = vadd.f32 1.0, %v2688_v43 }
 0x283   : > { %v2692_v28 = vpop.eup %2691  ;;  %1502 = vmatprep.subr.mxu1 %v1301_v21  ;;  %1414 = vmatpush1.msra.mxu0 %v1298_v1  ;;  %v1295_v62 = vmul.f32 %v1279_v44, %v1167_v26  ;;  %v1278_v7 = vadd.f32 1.0, %v2690_v39 }
 0x284   : > { %v2694_v10 = vpop.eup %2693  ;;  %1503 = vmatpush1.msra.mxu1 %v1300_v37  ;;  %v1297_v18 = vmul.f32 %v1281_v30, %v1169_v6  ;;  %v1280_v35 = vadd.f32 1.0, %v2692_v28 }
 0x285   : > { %v2696_v52 = vpop.eup %2695  ;;  %1415 = vmatprep.subr.mxu0 %v1295_v62  ;;  %v1294_v16 = vmul.f32 %v1278_v7, %v1166_v17  ;;  %v1275_v46 = vadd.f32 1.0, %v2694_v10 }
 0x286   : > { %v2698_v29 = vpop.eup %2697  ;;  %1504 = vmatprep.subr.mxu1 %v1297_v18  ;;  %v1296_v40 = vmul.f32 %v1280_v35, %v1168_v11  ;;  %v1277_v8 = vadd.f32 1.0, %v2696_v52 }
 0x287   : > { %v2700_v36 = vpop.eup %2699  ;;  %1416 = vmatpush1.msra.mxu0 %v1294_v16  ;;  %v1291_v41 = vmul.f32 %v1275_v46, %v1163_v34  ;;  %v1274_v32 = vadd.f32 1.0, %v2698_v29 }
 0x288   : > { %1505 = vmatpush1.msra.mxu1 %v1296_v40  ;;  %v1293_v9 = vmul.f32 %v1277_v8, %v1165_v22  ;;  %v1276_v33 = vadd.f32 1.0, %v2700_v36 }
 0x289   : > { %1417 = vmatprep.subr.mxu0 %v1291_v41  ;;  %v1290_v2 = vmul.f32 %v1274_v32, %v1162_v51 }
 0x28a   : > { %1506 = vmatprep.subr.mxu1 %v1293_v9  ;;  %v1292_v31 = vmul.f32 %v1276_v33, %v1164_v13 }
 0x28b   : > { %1418 = vmatpush1.msra.mxu0 %v1290_v2 }
 0x28c   : > { %1507 = vmatpush1.msra.mxu1 %v1292_v31  ;;  %2566 = vmatmul.mubr.msk.f32.vlgmr.msra.gmra.mxu0 %vm1374_vm2, %v1322_v60 }
 0x28d   : > { %2570 = vmatmul.mubr.msk.f32.vlgmr.msra.gmra.mxu1 %vm1374_vm2, %v1322_v60  ;;  %1838 = vmatprep.subr.mxu0 %v3391_v20  ;;  %v1325_v20 = vld [vmem:[%s3774_s5 + $0x18] sm:$0xff] }
 0x28e   : > { %1927 = vmatprep.subr.mxu1 %v3395_v27  ;;  %1839 = vmatpush1.msra.mxu0 %v3397_v38 }
 0x28f   : > { %1928 = vmatpush1.msra.mxu1 %v1304_v24  ;;  %1840 = vmatprep.subr.mxu0 %v1299_v48 }
 0x290   : > { %1929 = vmatprep.subr.mxu1 %v1301_v21  ;;  %1457 = vmatprep.mubr.f32.mxu0 %v2836_v3 }
 0x291   : > { %1546 = vmatprep.mubr.f32.mxu1 %v2836_v3  ;;  %1841 = vmatpush1.msra.mxu0 %v1298_v1 }
 0x292   : > { %1930 = vmatpush1.msra.mxu1 %v1300_v37  ;;  %2567 = vmatmul.mubr.msk.f32.gmra.mxu0 %vm1374_vm2, %v1323_v23 }
 0x293   : > { %2571 = vmatmul.mubr.msk.f32.gmra.mxu1 %vm1374_vm2, %v1323_v23  ;;  %1842 = vmatprep.subr.mxu0 %v1295_v62 }
 0x294   : > { %1931 = vmatprep.subr.mxu1 %v1297_v18  ;;  %1843 = vmatpush1.msra.mxu0 %v1294_v16 }
 0x295   : > { %1932 = vmatpush1.msra.mxu1 %v1296_v40  ;;  %1844 = vmatprep.subr.mxu0 %v1291_v41 }
 0x296   : > { %1933 = vmatprep.subr.mxu1 %v1293_v9  ;;  %1463 = vmatprep.mubr.f32.mxu0 %v2836_v3 }
 0x297   : > { %1552 = vmatprep.mubr.f32.mxu1 %v2836_v3  ;;  %1845 = vmatpush1.msra.mxu0 %v1290_v2 }
 0x298   : > { %1934 = vmatpush1.msra.mxu1 %v1292_v31  ;;  %2568 = vmatmul.mubr.msk.f32.gmra.mxu0 %vm1374_vm2, %v1324_v25 }
 0x299   : > { %2572 = vmatmul.mubr.msk.f32.gmra.mxu1 %vm1374_vm2, %v1324_v25  ;;  %1469 = vmatprep.mubr.f32.mxu0 %v2836_v3 }
 0x29a   : > { %1558 = vmatprep.mubr.f32.mxu1 %v2836_v3 }
 0x29c   : > { %2569 = vmatmul.mubr.msk.f32.gmra.mxu0 %vm1374_vm2, %v1325_v20 }
 0x29d   : > { %2573 = vmatmul.mubr.msk.f32.gmra.mxu1 %vm1374_vm2, %v1325_v20  ;;  %1886 = vmatprep.mubr.f32.mxu0 %v2836_v3 }
 0x29e   : > { %1975 = vmatprep.mubr.f32.mxu1 %v2836_v3 }
 0x34c   : > { %v1453_v27 = vpop.f32.mrf.mxu0 }
 0x34d   : > { %v1542_v38 = vpop.f32.mrf.mxu1  ;;  %v3444_v12 = vadd.f32 %v1453_v27, %v3237_v49 }
 0x34e   : > { %v1455_v47 = vpop.f32.mrf.mxu0  ;;  %v3447_v0 = vadd.f32 %v1542_v38, %v3239_v45 }
 0x34f   : > { %v1544_v24 = vpop.f32.mrf.mxu1  ;;  %v3450_v48 = vadd.f32 %v1455_v47, %v3241_v50  ;;  %v1613_v42 = vmul.f32 0.044715, %v3444_v12 }
 0x350   : > { %v1615_v43 = vmul.f32 0.044715, %v3447_v0  ;;  %v3455_v21 = vadd.f32 %v1544_v24, %v3243_v14 }
 0x351   : > { %v1614_v45 = vmul.f32 0.044715, %v3450_v48  ;;  %v1629_v39 = vmul.f32 %v1613_v42, %v3444_v12 }
 0x352   : > { %v1459_v19 = vpop.f32.mrf.mxu0  ;;  %v1631_v37 = vmul.f32 %v1615_v43, %v3447_v0  ;;  %v1616_v6 = vmul.f32 0.044715, %v3455_v21 }
 0x353   : > { %v1548_v1 = vpop.f32.mrf.mxu1  ;;  %v3458_v49 = vadd.f32 %v1459_v19, %v3245_v53  ;;  %v1630_v28 = vmul.f32 %v1614_v45, %v3450_v48  ;;  %v3476_v7 = vmul.f32 %v1629_v39, %v3444_v12 }
 0x354   : > { %v1461_v26 = vpop.f32.mrf.mxu0  ;;  %v3463_v50 = vadd.f32 %v1548_v1, %v3247_v4  ;;  %v3486_v11 = vmul.f32 %v1631_v37, %v3447_v0  ;;  %v1632_v35 = vmul.f32 %v1616_v6, %v3455_v21 }
 0x355   : > { %v1550_v44 = vpop.f32.mrf.mxu1  ;;  %v1617_v14 = vmul.f32 0.044715, %v3458_v49  ;;  %v3469_v30 = vadd.f32 %v1461_v26, %v3249_v54  ;;  %v1646_v36 = vmul.f32 %v1630_v28, %v3450_v48 }
 0x356   : > { %v1619_v4 = vmul.f32 0.044715, %v3463_v50  ;;  %v3480_v10 = vadd.f32 %v1550_v44, %v3251_v55  ;;  %v1648_v47 = vmul.f32 %v1632_v35, %v3455_v21 }
 0x357   : > { %v1633_v34 = vmul.f32 %v1617_v14, %v3458_v49  ;;  %v1618_v55 = vmul.f32 0.044715, %v3469_v30 }
 0x358   : > { %v1465_v53 = vpop.f32.mrf.mxu0  ;;  %v1635_v41 = vmul.f32 %v1619_v4, %v3463_v50  ;;  %v1620_v51 = vmul.f32 0.044715, %v3480_v10 }
 0x359   : > { %v3473_v62 = vadd.f32 %v1465_v53, %v3253_v15  ;;  %v1554_v17 = vpop.f32.mrf.mxu1  ;;  %v1634_v24 = vmul.f32 %v1618_v55, %v3469_v30 }
 0x35a   : > { %v3483_v18 = vadd.f32 %v1554_v17, %v3255_v56  ;;  %v1467_v54 = vpop.f32.mrf.mxu0  ;;  %v1651_v43 = vmul.f32 %v1635_v41, %v3463_v50  ;;  %v1636_v6 = vmul.f32 %v1620_v51, %v3480_v10 }
 0x35b   : > { %v1621_v15 = vmul.f32 0.044715, %v3473_v62  ;;  %v3491_v52 = vadd.f32 %v1467_v54, %v3257_v57  ;;  %v1556_v16 = vpop.f32.mrf.mxu1  ;;  %v1650_v55 = vmul.f32 %v1634_v24, %v3469_v30 }
 0x35c   : > { %v1623_v46 = vmul.f32 0.044715, %v3483_v18  ;;  %v3497_v56 = vadd.f32 %v1556_v16, %v3259_v58  ;;  %v1471_v29 = vpop.f32.mrf.mxu0  ;;  %v1652_v41 = vmul.f32 %v1636_v6, %v3480_v10 }
 0x35d   : > { %v1637_v40 = vmul.f32 %v1621_v15, %v3473_v62  ;;  %v1622_v22 = vmul.f32 0.044715, %v3491_v52  ;;  %v3502_v8 = vadd.f32 %v1471_v29, %v3261_v61  ;;  %v1560_v57 = vpop.f32.mrf.mxu1 }
 0x35e   : > { %v1624_v32 = vmul.f32 0.044715, %v3497_v56  ;;  %v3509_v58 = vadd.f32 %v1560_v57, %v3263_v5  ;;  %v1473_v9 = vpop.f32.mrf.mxu0  ;;  %v1639_v33 = vmul.f32 %v1623_v46, %v3483_v18  ;;  %v1666_v57 = vadd.f32 %v1650_v55, %v3469_v30 }
 0x35f   : > { %v1653_v13 = vmul.f32 %v1637_v40, %v3473_v62  ;;  %v1625_v61 = vmul.f32 0.044715, %v3502_v8  ;;  %v3515_v2 = vadd.f32 %v1473_v9, %v3265_v63  ;;  %v1562_v60 = vpop.f32.mrf.mxu1  ;;  %v1638_v31 = vmul.f32 %v1622_v22, %v3491_v52 }
 0x360   : > { %v1640_v23 = vmul.f32 %v1624_v32, %v3497_v56  ;;  %v1627_v25 = vmul.f32 0.044715, %v3509_v58  ;;  %v3521_v5 = vadd.f32 %v1562_v60, %v3267_v59  ;;  %v1649_v63 = vmul.f32 %v1633_v34, %v3458_v49 }
 0x361   : > { %v1669_v20 = vadd.f32 %v1653_v13, %v3473_v62  ;;  %v1641_v27 = vmul.f32 %v1625_v61, %v3502_v8  ;;  %v1626_v38 = vmul.f32 0.044715, %v3515_v2  ;;  %v1655_v59 = vmul.f32 %v1639_v33, %v3483_v18 }
 0x362   : > { %v1643_v42 = vmul.f32 %v1627_v25, %v3509_v58  ;;  %v1628_v19 = vmul.f32 0.044715, %v3521_v5  ;;  %v1654_v39 = vmul.f32 %v1638_v31, %v3491_v52  ;;  %v1656_v37 = vmul.f32 %v1640_v23, %v3497_v56 }
 0x363   : > { %v1657_v1 = vmul.f32 %v1641_v27, %v3502_v8  ;;  %v1642_v26 = vmul.f32 %v1626_v38, %v3515_v2  ;;  %v1685_v28 = vmul.f32 0.7978846, %v1669_v20  ;;  %v1671_v15 = vadd.f32 %v1655_v59, %v3483_v18 }
 0x364   : > { %v1659_v45 = vmul.f32 %v1643_v42, %v3509_v58  ;;  %v1644_v44 = vmul.f32 %v1628_v19, %v3521_v5  ;;  %v1670_v54 = vadd.f32 %v1654_v39, %v3491_v52  ;;  %v1672_v35 = vadd.f32 %v1656_v37, %v3497_v56 }
 0x365   : > { %v1673_v14 = vadd.f32 %v1657_v1, %v3502_v8  ;;  %v1658_v53 = vmul.f32 %v1642_v26, %v3515_v2  ;;  %2701 = vtanh.f32 %v1685_v28  ;;  %v1665_v51 = vadd.f32 %v1649_v63, %v3458_v49 }
 0x366   : > { %v1675_v17 = vadd.f32 %v1659_v45, %v3509_v58  ;;  %v1660_v4 = vmul.f32 %v1644_v44, %v3521_v5  ;;  %v1686_v40 = vmul.f32 0.7978846, %v1670_v54  ;;  %v1688_v9 = vmul.f32 0.7978846, %v1672_v35 }
 0x367   : > { %v1674_v16 = vadd.f32 %v1658_v53, %v3515_v2  ;;  %v1689_v34 = vmul.f32 0.7978846, %v1673_v14  ;;  %v1667_v13 = vadd.f32 %v1651_v43, %v3463_v50  ;;  %v1687_v33 = vmul.f32 0.7978846, %v1671_v15 }
 0x368   : > { %v1676_v46 = vadd.f32 %v1660_v4, %v3521_v5  ;;  %v1691_v29 = vmul.f32 0.7978846, %v1675_v17  ;;  %v1668_v61 = vadd.f32 %v1652_v41, %v3480_v10  ;;  %v1682_v60 = vmul.f32 0.7978846, %v1666_v57 }
 0x369   : > { %v1690_v22 = vmul.f32 0.7978846, %v1674_v16  ;;  %2703 = vtanh.f32 %v1689_v34  ;;  %v1662_v31 = vadd.f32 %v1646_v36, %v3450_v48  ;;  %v1664_v25 = vadd.f32 %v1648_v47, %v3455_v21 }
 0x36a   : > { %v1692_v32 = vmul.f32 0.7978846, %v1676_v46  ;;  %2705 = vtanh.f32 %v1691_v29  ;;  %v1684_v23 = vmul.f32 0.7978846, %v1668_v61  ;;  %v1661_v20 = vadd.f32 %v3476_v7, %v3444_v12 }
 0x36b   : > { %2707 = vtanh.f32 %v1690_v22  ;;  %v1681_v27 = vmul.f32 0.7978846, %v1665_v51  ;;  %v1663_v38 = vadd.f32 %v3486_v11, %v3447_v0  ;;  %v1683_v63 = vmul.f32 0.7978846, %v1667_v13 }
 0x36c   : > { %2709 = vtanh.f32 %v1692_v32  ;;  %v1678_v24 = vmul.f32 0.7978846, %v1662_v31  ;;  %v1680_v42 = vmul.f32 0.7978846, %v1664_v25  ;;  %v1677_v36 = vmul.f32 0.7978846, %v1661_v20 }
 0x36d   : > { %2711 = vtanh.f32 %v1686_v40  ;;  %v1679_v19 = vmul.f32 0.7978846, %v1663_v38  ;;  %v1610_v26 = vmul.f32 0.5, %v3515_v2  ;;  %v1605_v39 = vmul.f32 0.5, %v3473_v62 }
 0x36e   : > { %2713 = vtanh.f32 %v1688_v9  ;;  %v1612_v6 = vmul.f32 0.5, %v3521_v5  ;;  %v1609_v53 = vmul.f32 0.5, %v3502_v8  ;;  %v1611_v54 = vmul.f32 0.5, %v3509_v58 }
 0x36f   : > { %2715 = vtanh.f32 %v1687_v33  ;;  %v1606_v35 = vmul.f32 0.5, %v3491_v52  ;;  %v1608_v62 = vmul.f32 0.5, %v3497_v56  ;;  %v1607_v29 = vmul.f32 0.5, %v3483_v18 }
 0x370   : > { %2717 = vtanh.f32 %v1682_v60  ;;  %v1602_v57 = vmul.f32 0.5, %v3469_v30  ;;  %v1604_v32 = vmul.f32 0.5, %v3480_v10  ;;  %v1601_v33 = vmul.f32 0.5, %v3458_v49 }
 0x371   : > { %2719 = vtanh.f32 %v1684_v23  ;;  %v1603_v30 = vmul.f32 0.5, %v3463_v50 }
 0x372   : > { %2721 = vtanh.f32 %v1681_v27  ;;  %v2702_v47 = vpop.eup %2701  ;;  %v1598_v27 = vmul.f32 0.5, %v3450_v48 }
 0x373   : > { %2723 = vtanh.f32 %v1683_v63  ;;  %v1717_v28 = vadd.f32 1.0, %v2702_v47 }
 0x374   : > { %2725 = vtanh.f32 %v1678_v24  ;;  %v1600_v24 = vmul.f32 0.5, %v3455_v21 }
 0x375   : > { %2727 = vtanh.f32 %v1680_v42  ;;  %v1733_v52 = vmul.f32 %v1717_v28, %v1605_v39  ;;  %v1796_v39 = vld [vmem:[#allocation3 + $0x190] sm:$0xff] }
 0x376   : > { %v2704_v43 = vpop.eup %2703  ;;  %2729 = vtanh.f32 %v1677_v36 }
 0x377   : > { %v2706_v7 = vpop.eup %2705  ;;  %2731 = vtanh.f32 %v1679_v19  ;;  %v1721_v1 = vadd.f32 1.0, %v2704_v43  ;;  %v1597_v19 = vmul.f32 0.5, %v3444_v12  ;;  %v1599_v43 = vmul.f32 0.5, %v3447_v0  ;;  %v2575_v12 = vld [vmem:[%s3774_s5 + $0x28] sm:$0xff]  ;;  %v2576_v0 = vld [vmem:[%s3774_s5 + $0x30] sm:$0xff] }
 0x378   : > { %v2708_v59 = vpop.eup %2707  ;;  %v1723_v44 = vadd.f32 1.0, %v2706_v7 }
 0x379   : > { %v2710_v11 = vpop.eup %2709  ;;  %v1722_v45 = vadd.f32 1.0, %v2708_v59  ;;  %v1737_v34 = vmul.f32 %v1721_v1, %v1609_v53  ;;  %v2574_v59 = vld [vmem:[%s3774_s5 + $0x20] sm:$0xff]  ;;  %v2577_v1 = vld [vmem:[%s3774_s5 + $0x38] sm:$0xff]  ;;  %v1795_v53 = vld [vmem:[#allocation3 + $0x188] sm:$0xff] }
 0x37a   : > { %v2712_v37 = vpop.eup %2711  ;;  %v1724_v14 = vadd.f32 1.0, %v2710_v11  ;;  %v1739_v5 = vmul.f32 %v1723_v44, %v1611_v54 }
 0x37b   : > { %v2714_v17 = vpop.eup %2713  ;;  %v3565_v4 = vmul.f32 %v1722_v45, %v1610_v26  ;;  %v1718_v15 = vadd.f32 1.0, %v2712_v37  ;;  %v1794_v26 = vld [vmem:[#allocation3 + $0x180] sm:$0xff] }
 0x37c   : > { %v2716_v2 = vpop.eup %2715  ;;  %v1740_v16 = vmul.f32 %v1724_v14, %v1612_v6  ;;  %v1720_v55 = vadd.f32 1.0, %v2714_v17 }
 0x37d   : > { %v2718_v46 = vpop.eup %2717  ;;  %1846 = vmatprep.subr.mxu0 %v3565_v4  ;;  %v1734_v8 = vmul.f32 %v1718_v15, %v1606_v35  ;;  %v1719_v40 = vadd.f32 1.0, %v2716_v2  ;;  %v1798_v15 = vld [vmem:[#allocation3 + $0x1a0] sm:$0xff] }
 0x37e   : > { %v2720_v22 = vpop.eup %2719  ;;  %1935 = vmatprep.subr.mxu1 %v1740_v16  ;;  %1847 = vmatpush1.msra.mxu0 %v1737_v34  ;;  %v1736_v58 = vmul.f32 %v1720_v55, %v1608_v62  ;;  %v1714_v41 = vadd.f32 1.0, %v2718_v46  ;;  %v1800_v55 = vld [vmem:[#allocation3 + $0x1b0] sm:$0xff] }
 0x37f   : > { %v2722_v51 = vpop.eup %2721  ;;  %1936 = vmatpush1.msra.mxu1 %v1739_v5  ;;  %1848 = vmatprep.subr.mxu0 %v1734_v8  ;;  %v1735_v56 = vmul.f32 %v1719_v40, %v1607_v29  ;;  %v1716_v9 = vadd.f32 1.0, %v2720_v22  ;;  %v1799_v22 = vld [vmem:[#allocation3 + $0x1a8] sm:$0xff] }
 0x380   : > { %v2724_v13 = vpop.eup %2723  ;;  %1937 = vmatprep.subr.mxu1 %v1736_v58  ;;  %1849 = vmatpush1.msra.mxu0 %v1733_v52  ;;  %v1730_v18 = vmul.f32 %v1714_v41, %v1602_v57  ;;  %v1713_v61 = vadd.f32 1.0, %v2722_v51  ;;  %v1802_v57 = vld [vmem:[#allocation3 + $0x1c0] sm:$0xff] }
 0x381   : > { %v2726_v60 = vpop.eup %2725  ;;  %1938 = vmatpush1.msra.mxu1 %v1735_v56  ;;  %v1732_v31 = vmul.f32 %v1716_v9, %v1604_v32  ;;  %v1715_v23 = vadd.f32 1.0, %v2724_v13  ;;  %v1804_v9 = vld [vmem:[#allocation3 + $0x1d0] sm:$0xff] }
 0x382   : > { %v2728_v25 = vpop.eup %2727  ;;  %1850 = vmatprep.subr.mxu0 %v1730_v18  ;;  %v1729_v20 = vmul.f32 %v1713_v61, %v1601_v33  ;;  %v1710_v10 = vadd.f32 1.0, %v2726_v60 }
 0x383   : > { %v2730_v38 = vpop.eup %2729  ;;  %1939 = vmatprep.subr.mxu1 %v1732_v31  ;;  %v1731_v63 = vmul.f32 %v1715_v23, %v1603_v30  ;;  %v1712_v42 = vadd.f32 1.0, %v2728_v25 }
 0x384   : > { %v2732_v49 = vpop.eup %2731  ;;  %1851 = vmatpush1.msra.mxu0 %v1729_v20  ;;  %v1726_v36 = vmul.f32 %v1710_v10, %v1598_v27  ;;  %v1709_v47 = vadd.f32 1.0, %v2730_v38  ;;  %v1805_v10 = vld [vmem:[#allocation3 + $0x1d8] sm:$0xff] }
 0x385   : > { %1940 = vmatpush1.msra.mxu1 %v1731_v63  ;;  %v1728_v50 = vmul.f32 %v1712_v42, %v1600_v24  ;;  %v1711_v7 = vadd.f32 1.0, %v2732_v49 }
 0x386   : > { %1852 = vmatprep.subr.mxu0 %v1726_v36  ;;  %v1725_v48 = vmul.f32 %v1709_v47, %v1597_v19 }
 0x387   : > { %1941 = vmatprep.subr.mxu1 %v1728_v50  ;;  %v1727_v21 = vmul.f32 %v1711_v7, %v1599_v43  ;;  %v1808_v7 = vld [vmem:[#allocation3 + $0x1f0] sm:$0xff] }
 0x388   : > { %1853 = vmatpush1.msra.mxu0 %v1725_v48 }
 0x389   : > { %1942 = vmatpush1.msra.mxu1 %v1727_v21  ;;  %2578 = vmatmul.mubr.msk.f32.vlgmr.msra.gmra.mxu0 %vm1374_vm2, %v2574_v59 }
 0x38a   : > { %2582 = vmatmul.mubr.msk.f32.vlgmr.msra.gmra.mxu1 %vm1374_vm2, %v2574_v59  ;;  %2244 = vmatprep.subr.mxu0 %v3565_v4  ;;  %v1797_v4 = vld [vmem:[#allocation3 + $0x198] sm:$0xff] }
 0x38b   : > { %2315 = vmatprep.subr.mxu1 %v1740_v16  ;;  %2245 = vmatpush1.msra.mxu0 %v1737_v34 }
 0x38c   : > { %2316 = vmatpush1.msra.mxu1 %v1739_v5  ;;  %2246 = vmatprep.subr.mxu0 %v1734_v8 }
 0x38d   : > { %2317 = vmatprep.subr.mxu1 %v1736_v58  ;;  %1892 = vmatprep.mubr.f32.mxu0 %v2836_v3 }
 0x38e   : > { %1981 = vmatprep.mubr.f32.mxu1 %v2836_v3  ;;  %2247 = vmatpush1.msra.mxu0 %v1733_v52 }
 0x38f   : > { %2318 = vmatpush1.msra.mxu1 %v1735_v56  ;;  %2579 = vmatmul.mubr.msk.f32.gmra.mxu0 %vm1374_vm2, %v2575_v12  ;;  %v1801_v56 = vld [vmem:[#allocation3 + $0x1b8] sm:$0xff] }
 0x390   : > { %2583 = vmatmul.mubr.msk.f32.gmra.mxu1 %vm1374_vm2, %v2575_v12  ;;  %2248 = vmatprep.subr.mxu0 %v1730_v18 }
 0x391   : > { %2319 = vmatprep.subr.mxu1 %v1732_v31  ;;  %2249 = vmatpush1.msra.mxu0 %v1729_v20  ;;  %v1803_v31 = vld [vmem:[#allocation3 + $0x1c8] sm:$0xff] }
 0x392   : > { %2320 = vmatpush1.msra.mxu1 %v1731_v63  ;;  %2250 = vmatprep.subr.mxu0 %v1726_v36  ;;  %v1806_v36 = vld [vmem:[#allocation3 + $0x1e0] sm:$0xff] }
 0x393   : > { %2321 = vmatprep.subr.mxu1 %v1728_v50  ;;  %1898 = vmatprep.mubr.f32.mxu0 %v2836_v3 }
 0x394   : > { %1987 = vmatprep.mubr.f32.mxu1 %v2836_v3  ;;  %2251 = vmatpush1.msra.mxu0 %v1725_v48 }
 0x395   : > { %2322 = vmatpush1.msra.mxu1 %v1727_v21  ;;  %2580 = vmatmul.mubr.msk.f32.gmra.mxu0 %vm1374_vm2, %v2576_v0 }
 0x396   : > { %2584 = vmatmul.mubr.msk.f32.gmra.mxu1 %vm1374_vm2, %v2576_v0  ;;  %1904 = vmatprep.mubr.f32.mxu0 %v2836_v3 }
 0x397   : > { %1993 = vmatprep.mubr.f32.mxu1 %v2836_v3 }
 0x399   : > { %2581 = vmatmul.mubr.msk.f32.gmra.mxu0 %vm1374_vm2, %v2577_v1 }
 0x39a   : > { %2585 = vmatmul.mubr.msk.f32.gmra.mxu1 %vm1374_vm2, %v2577_v1  ;;  %2292 = vmatprep.mubr.f32.mxu0 %v2836_v3 }
 0x39b   : > { %2363 = vmatprep.mubr.f32.mxu1 %v2836_v3 }
 0x449   : > { %v1888_v11 = vpop.f32.mrf.mxu0 }
 0x44a   : > { %v1977_v45 = vpop.f32.mrf.mxu1  ;;  %v3609_v44 = vadd.f32 %v1888_v11, %v1794_v26  ;;  %v1807_v11 = vld [vmem:[#allocation3 + $0x1e8] sm:$0xff] }
 0x44b   : > { %v1890_v37 = vpop.f32.mrf.mxu0  ;;  %v3611_v6 = vadd.f32 %v1977_v45, %v1796_v39 }
 0x44c   : > { %v1979_v14 = vpop.f32.mrf.mxu1  ;;  %v3613_v28 = vadd.f32 %v1890_v37, %v1795_v53  ;;  %v2048_v17 = vmul.f32 0.044715, %v3609_v44  ;;  %v1809_v53 = vld [vmem:[#allocation3 + $0x1f8] sm:$0xff] }
 0x44d   : > { %v2050_v35 = vmul.f32 0.044715, %v3611_v6  ;;  %v3617_v3 = vadd.f32 %v1979_v14, %v1797_v4 }
 0x44e   : > { %v2049_v62 = vmul.f32 0.044715, %v3613_v28  ;;  %v2064_v5 = vmul.f32 %v2048_v17, %v3609_v44 }
 0x44f   : > { %v1894_v54 = vpop.f32.mrf.mxu0  ;;  %v2066_v29 = vmul.f32 %v2050_v35, %v3611_v6  ;;  %v2051_v40 = vmul.f32 0.044715, %v3617_v3 }
 0x450   : > { %v1983_v2 = vpop.f32.mrf.mxu1  ;;  %v3619_v16 = vadd.f32 %v1894_v54, %v1798_v15  ;;  %v2065_v51 = vmul.f32 %v2049_v62, %v3613_v28  ;;  %v3634_v18 = vmul.f32 %v2064_v5, %v3609_v44 }
 0x451   : > { %v1896_v34 = vpop.f32.mrf.mxu0  ;;  %v3623_v8 = vadd.f32 %v1983_v2, %v1800_v55  ;;  %v3642_v23 = vmul.f32 %v2066_v29, %v3611_v6  ;;  %v2067_v25 = vmul.f32 %v2051_v40, %v3617_v3 }
 0x452   : > { %v1985_v46 = vpop.f32.mrf.mxu1  ;;  %v2052_v58 = vmul.f32 0.044715, %v3619_v16  ;;  %v3628_v52 = vadd.f32 %v1896_v34, %v1799_v22  ;;  %v3658_v59 = vmul.f32 %v2065_v51, %v3613_v28 }
 0x453   : > { %v2054_v33 = vmul.f32 0.044715, %v3623_v8  ;;  %v3637_v61 = vadd.f32 %v1985_v46, %v1801_v56  ;;  %v2083_v55 = vmul.f32 %v2067_v25, %v3617_v3 }
 0x454   : > { %v2068_v63 = vmul.f32 %v2052_v58, %v3619_v16  ;;  %v2053_v24 = vmul.f32 0.044715, %v3628_v52 }
 0x455   : > { %v1900_v41 = vpop.f32.mrf.mxu0  ;;  %v2070_v21 = vmul.f32 %v2054_v33, %v3623_v8  ;;  %v2055_v12 = vmul.f32 0.044715, %v3637_v61 }
 0x456   : > { %v3631_v32 = vadd.f32 %v1900_v41, %v1802_v57  ;;  %v1989_v13 = vpop.f32.mrf.mxu1  ;;  %v2084_v46 = vmul.f32 %v2068_v63, %v3619_v16  ;;  %v2069_v5 = vmul.f32 %v2053_v24, %v3628_v52 }
 0x457   : > { %v3639_v60 = vadd.f32 %v1989_v13, %v1804_v9  ;;  %v1902_v30 = vpop.f32.mrf.mxu0  ;;  %v2086_v22 = vmul.f32 %v2070_v21, %v3623_v8  ;;  %v2071_v33 = vmul.f32 %v2055_v12, %v3637_v61 }
 0x458   : > { %v2056_v20 = vmul.f32 0.044715, %v3631_v32  ;;  %v3646_v27 = vadd.f32 %v1902_v30, %v1803_v31  ;;  %v1991_v38 = vpop.f32.mrf.mxu1 }
 0x459   : > { %v2058_v42 = vmul.f32 0.044715, %v3639_v60  ;;  %v3651_v49 = vadd.f32 %v1991_v38, %v1805_v10  ;;  %v1906_v19 = vpop.f32.mrf.mxu0  ;;  %v2087_v12 = vmul.f32 %v2071_v33, %v3637_v61 }
 0x45a   : > { %v2072_v47 = vmul.f32 %v2056_v20, %v3631_v32  ;;  %v2057_v50 = vmul.f32 0.044715, %v3646_v27  ;;  %v3655_v43 = vadd.f32 %v1906_v19, %v1806_v36  ;;  %v1995_v48 = vpop.f32.mrf.mxu1  ;;  %v2085_v19 = vmul.f32 %v2069_v5, %v3628_v52 }
 0x45b   : > { %v2059_v0 = vmul.f32 0.044715, %v3651_v49  ;;  %v3663_v1 = vadd.f32 %v1995_v48, %v1808_v7  ;;  %v1908_v26 = vpop.f32.mrf.mxu0  ;;  %v2074_v39 = vmul.f32 %v2058_v42, %v3639_v60 }
 0x45c   : > { %v2088_v45 = vmul.f32 %v2072_v47, %v3631_v32  ;;  %v2060_v37 = vmul.f32 0.044715, %v3655_v43  ;;  %v3668_v14 = vadd.f32 %v1908_v26, %v1807_v11  ;;  %v1997_v17 = vpop.f32.mrf.mxu1  ;;  %v2073_v4 = vmul.f32 %v2057_v50, %v3646_v27 }
 0x45d   : > { %v2075_v54 = vmul.f32 %v2059_v0, %v3651_v49  ;;  %v2062_v35 = vmul.f32 0.044715, %v3663_v1  ;;  %v3673_v15 = vadd.f32 %v1997_v17, %v1809_v53  ;;  %v2090_v58 = vmul.f32 %v2074_v39, %v3639_v60 }
 0x45e   : > { %v2104_v2 = vadd.f32 %v2088_v45, %v3631_v32  ;;  %v2076_v34 = vmul.f32 %v2060_v37, %v3655_v43  ;;  %v2061_v62 = vmul.f32 0.044715, %v3668_v14  ;;  %v2089_v9 = vmul.f32 %v2073_v4, %v3646_v27 }
 0x45f   : > { %v2078_v29 = vmul.f32 %v2062_v35, %v3663_v1  ;;  %v2063_v40 = vmul.f32 0.044715, %v3673_v15  ;;  %v2091_v13 = vmul.f32 %v2075_v54, %v3651_v49  ;;  %v2106_v24 = vadd.f32 %v2090_v58, %v3639_v60 }
 0x460   : > { %v2092_v57 = vmul.f32 %v2076_v34, %v3655_v43  ;;  %v2077_v41 = vmul.f32 %v2061_v62, %v3668_v14  ;;  %v2120_v25 = vmul.f32 0.7978846, %v2104_v2  ;;  %v2105_v38 = vadd.f32 %v2089_v9, %v3646_v27 }
 0x461   : > { %v2094_v51 = vmul.f32 %v2078_v29, %v3663_v1  ;;  %v2079_v56 = vmul.f32 %v2063_v40, %v3673_v15  ;;  %v2107_v63 = vadd.f32 %v2091_v13, %v3651_v49  ;;  %v2101_v21 = vadd.f32 %v2085_v19, %v3628_v52 }
 0x462   : > { %v2108_v31 = vadd.f32 %v2092_v57, %v3655_v43  ;;  %v2093_v30 = vmul.f32 %v2077_v41, %v3668_v14  ;;  %v2121_v7 = vmul.f32 0.7978846, %v2105_v38  ;;  %2733 = vtanh.f32 %v2120_v25 }
 0x463   : > { %v2110_v20 = vadd.f32 %v2094_v51, %v3663_v1  ;;  %v2095_v10 = vmul.f32 %v2079_v56, %v3673_v15  ;;  %v2100_v0 = vadd.f32 %v2084_v46, %v3619_v16  ;;  %v2123_v26 = vmul.f32 0.7978846, %v2107_v63 }
 0x464   : > { %v2109_v42 = vadd.f32 %v2093_v30, %v3668_v14  ;;  %v2124_v36 = vmul.f32 0.7978846, %v2108_v31  ;;  %v2102_v45 = vadd.f32 %v2086_v22, %v3623_v8  ;;  %v2122_v39 = vmul.f32 0.7978846, %v2106_v24 }
 0x465   : > { %v2111_v47 = vadd.f32 %v2095_v10, %v3673_v15  ;;  %v2126_v50 = vmul.f32 0.7978846, %v2110_v20  ;;  %v2103_v37 = vadd.f32 %v2087_v12, %v3637_v61  ;;  %v2117_v53 = vmul.f32 0.7978846, %v2101_v21 }
 0x466   : > { %v2125_v48 = vmul.f32 0.7978846, %v2109_v42  ;;  %2735 = vtanh.f32 %v2124_v36  ;;  %v2097_v17 = vadd.f32 %v3658_v59, %v3613_v28  ;;  %v2099_v54 = vadd.f32 %v2083_v55, %v3617_v3 }
 0x467   : > { %v2127_v11 = vmul.f32 0.7978846, %v2111_v47  ;;  %2737 = vtanh.f32 %v2126_v50  ;;  %v2119_v4 = vmul.f32 0.7978846, %v2103_v37  ;;  %v2096_v35 = vadd.f32 %v3634_v18, %v3609_v44 }
 0x468   : > { %2739 = vtanh.f32 %v2125_v48  ;;  %v2116_v2 = vmul.f32 0.7978846, %v2100_v0  ;;  %v2098_v34 = vadd.f32 %v3642_v23, %v3611_v6  ;;  %v2118_v62 = vmul.f32 0.7978846, %v2102_v45 }
 0x469   : > { %2741 = vtanh.f32 %v2127_v11  ;;  %v2113_v46 = vmul.f32 0.7978846, %v2097_v17  ;;  %v2115_v5 = vmul.f32 0.7978846, %v2099_v54  ;;  %v2112_v59 = vmul.f32 0.7978846, %v2096_v35 }
 0x46a   : > { %2743 = vtanh.f32 %v2121_v7  ;;  %v2114_v29 = vmul.f32 0.7978846, %v2098_v34  ;;  %v2045_v57 = vmul.f32 0.5, %v3668_v14  ;;  %v2040_v56 = vmul.f32 0.5, %v3631_v32 }
 0x46b   : > { %2745 = vtanh.f32 %v2123_v26  ;;  %v2047_v13 = vmul.f32 0.5, %v3673_v15  ;;  %v2044_v31 = vmul.f32 0.5, %v3655_v43  ;;  %v2046_v10 = vmul.f32 0.5, %v3663_v1 }
 0x46c   : > { %2747 = vtanh.f32 %v2122_v39  ;;  %v2041_v38 = vmul.f32 0.5, %v3646_v27  ;;  %v2043_v36 = vmul.f32 0.5, %v3651_v49  ;;  %v2042_v43 = vmul.f32 0.5, %v3639_v60 }
 0x46d   : > { %2749 = vtanh.f32 %v2117_v53  ;;  %v2037_v27 = vmul.f32 0.5, %v3628_v52  ;;  %v2039_v0 = vmul.f32 0.5, %v3637_v61  ;;  %v2036_v45 = vmul.f32 0.5, %v3619_v16 }
 0x46e   : > { %2751 = vtanh.f32 %v2119_v4  ;;  %v2038_v52 = vmul.f32 0.5, %v3623_v8  ;;  %v2033_v35 = vmul.f32 0.5, %v3613_v28 }
 0x46f   : > { %2753 = vtanh.f32 %v2116_v2  ;;  %v2734_v55 = vpop.eup %2733 }
 0x470   : > { %2755 = vtanh.f32 %v2118_v62  ;;  %v2152_v30 = vadd.f32 1.0, %v2734_v55  ;;  %v2035_v62 = vmul.f32 0.5, %v3617_v3  ;;  %v2034_v55 = vmul.f32 0.5, %v3611_v6 }
 0x471   : > { %2757 = vtanh.f32 %v2113_v46 }
 0x472   : > { %2759 = vtanh.f32 %v2115_v5  ;;  %v2168_v48 = vmul.f32 %v2152_v30, %v2040_v56 }
 0x473   : > { %v2736_v40 = vpop.eup %2735  ;;  %2761 = vtanh.f32 %v2112_v59  ;;  %v2032_v59 = vmul.f32 0.5, %v3609_v44  ;;  %v2373_v44 = vlaneseq }
 0x474   : > { %v2738_v18 = vpop.eup %2737  ;;  %2763 = vtanh.f32 %v2114_v29  ;;  %v2156_v58 = vadd.f32 1.0, %v2736_v40 }
 0x475   : > { %v2740_v22 = vpop.eup %2739  ;;  %v2158_v51 = vadd.f32 1.0, %v2738_v18  ;;  %v2192_v18 = vld [vmem:[%s3775_s6] sm:$0xff]  ;;  %vm2440_vm3 = vcmp.lt.s32.totalorder %v2373_v44, 512 }
 0x476   : > { %v2742_v23 = vpop.eup %2741  ;;  %v2157_v41 = vadd.f32 1.0, %v2740_v22  ;;  %v2172_v42 = vmul.f32 %v2156_v58, %v2044_v31  ;;  %v2374_v22 = vshrl.u32 %v2373_v44, 7 }
 0x477   : > { %v2744_v9 = vpop.eup %2743  ;;  %v2159_v33 = vadd.f32 1.0, %v2742_v23  ;;  %v2174_v15 = vmul.f32 %v2158_v51, %v2046_v10  ;;  %v2371_v23 = vld [vmem:[#allocation3 + $0x200] ss:$8 sm:$0xf] }
 0x478   : > { %v2746_v25 = vpop.eup %2745  ;;  %v2173_v20 = vmul.f32 %v2157_v41, %v2045_v57  ;;  %v2153_v63 = vadd.f32 1.0, %v2744_v9  ;;  %v2375_v58 = vsub.s32 0, %v2374_v22  ;;  %v2383_v6 = vsub.s32 2, %v2374_v22 }
 0x479   : > { %v2748_v24 = vpop.eup %2747  ;;  %v2175_v14 = vmul.f32 %v2159_v33, %v2047_v13  ;;  %v2155_v32 = vadd.f32 1.0, %v2746_v25  ;;  %v2379_v57 = vsub.s32 1, %v2374_v22  ;;  %v2387_v41 = vsub.s32 3, %v2374_v22 }
 0x47a   : > { %v2750_v19 = vpop.eup %2749  ;;  %2252 = vmatprep.subr.mxu0 %v2173_v20  ;;  %v2169_v47 = vmul.f32 %v2153_v63, %v2041_v38  ;;  %v2154_v50 = vadd.f32 1.0, %v2748_v24  ;;  %v2376_v51 = vrot.slane %v2371_v23, %v2375_v58  ;;  %v2384_v9 = vrot.slane %v2371_v23, %v2383_v6 }
 0x47b   : > { %v2752_v7 = vpop.eup %2751  ;;  %2323 = vmatprep.subr.mxu1 %v2175_v14  ;;  %2253 = vmatpush1.msra.mxu0 %v2172_v42  ;;  %v2171_v1 = vmul.f32 %v2155_v32, %v2043_v36  ;;  %v2149_v21 = vadd.f32 1.0, %v2750_v19  ;;  %v2380_v31 = vrot.slane %v2371_v23, %v2379_v57  ;;  %v2388_v20 = vrot.slane %v2371_v23, %v2387_v41 }
 0x47c   : > { %v2754_v12 = vpop.eup %2753  ;;  %2324 = vmatpush1.msra.mxu1 %v2174_v15  ;;  %2254 = vmatprep.subr.mxu0 %v2169_v47  ;;  %v2170_v49 = vmul.f32 %v2154_v50, %v2042_v43  ;;  %v2151_v11 = vadd.f32 1.0, %v2752_v7  ;;  %v2837_v24 = vmov 1966171168  }
 0x47d   : > { %v2756_v26 = vpop.eup %2755  ;;  %2325 = vmatprep.subr.mxu1 %v2171_v1  ;;  %2255 = vmatpush1.msra.mxu0 %v2168_v48  ;;  %v2165_v60 = vmul.f32 %v2149_v21, %v2037_v27  ;;  %v2148_v39 = vadd.f32 1.0, %v2754_v12  ;;  %v2416_v14 = vunpack.c.l.s4 %v2837_v24 }
 0x47e   : > { %v2758_v37 = vpop.eup %2757  ;;  %2326 = vmatpush1.msra.mxu1 %v2170_v49  ;;  %v2167_v53 = vmul.f32 %v2151_v11, %v2039_v0  ;;  %v2150_v17 = vadd.f32 1.0, %v2756_v26 }
 0x47f   : > { %v2760_v4 = vpop.eup %2759  ;;  %2256 = vmatprep.subr.mxu0 %v2165_v60  ;;  %v2164_v54 = vmul.f32 %v2148_v39, %v2036_v45  ;;  %v2145_v61 = vadd.f32 1.0, %v2758_v37  ;;  %v2417_v19 = vunpack.c.0.s8 %v2416_v14 }
 0x480   : > { %v2762_v2 = vpop.eup %2761  ;;  %2327 = vmatprep.subr.mxu1 %v2167_v53  ;;  %v2166_v34 = vmul.f32 %v2150_v17, %v2038_v52  ;;  %v2147_v46 = vadd.f32 1.0, %v2760_v4 }
 0x481   : > { %v2764_v16 = vpop.eup %2763  ;;  %2257 = vmatpush1.msra.mxu0 %v2164_v54  ;;  %v2161_v5 = vmul.f32 %v2145_v61, %v2033_v35  ;;  %v2144_v29 = vadd.f32 1.0, %v2762_v2  ;;  %v2420_v27 = vsub.s32 %v2417_v19, %v2374_v22 }
 0x482   : > { %2328 = vmatpush1.msra.mxu1 %v2166_v34  ;;  %v2163_v8 = vmul.f32 %v2147_v46, %v2035_v62  ;;  %v2146_v40 = vadd.f32 1.0, %v2764_v16 }
 0x483   : > { %2258 = vmatprep.subr.mxu0 %v2161_v5  ;;  %v2160_v28 = vmul.f32 %v2144_v29, %v2032_v59 }
 0x484   : > { %2329 = vmatprep.subr.mxu1 %v2163_v8  ;;  %v2162_v3 = vmul.f32 %v2146_v40, %v2034_v55 }
 0x485   : > { %2259 = vmatpush1.msra.mxu0 %v2160_v28 }
 0x486   : > { %2330 = vmatpush1.msra.mxu1 %v2162_v3  ;;  %2586 = vmatmul.mubr.msk.f32.vlgmr.msra.gmra.mxu0 %vm1374_vm2, %v2192_v18 }
 0x487   : > { %2587 = vmatmul.mubr.msk.f32.vlgmr.msra.gmra.mxu1 %vm1374_vm2, %v2192_v18 }
 0x546   : > { %v2294_v56 = vpop.f32.mrf.mxu0 }
 0x547   : > { %v2393_v13 = vadd.f32 %v2376_v51, %v2294_v56  ;;  %v2365_v33 = vpop.f32.mrf.mxu1 }
 0x548   : > { %v2395_v30 = vadd.f32 %v2384_v9, %v2365_v33  ;;  %v2296_v25 = vpop.f32.mrf.mxu0 }
 0x549   : > { %2765 = vtanh.f32 %v2393_v13  ;;  %v2394_v10 = vadd.f32 %v2380_v31, %v2296_v25  ;;  %v2367_v38 = vpop.f32.mrf.mxu1 }
 0x54a   : > { %2767 = vtanh.f32 %v2395_v30  ;;  %v2396_v63 = vadd.f32 %v2388_v20, %v2367_v38 }
 0x54b   : > { %2769 = vtanh.f32 %v2394_v10 }
 0x54c   : > { %2771 = vtanh.f32 %v2396_v63 }
 0x556   : > { %v2766_v42 = vpop.eup %2765 }
 0x557   : > { %v2768_v36 = vpop.eup %2767  ;;  %v2401_v32 = vadd.f32 1.0, %v2766_v42 }
 0x558   : > { %v2770_v15 = vpop.eup %2769  ;;  %v2403_v47 = vadd.f32 1.0, %v2768_v36 }
 0x559   : > { %v2772_v43 = vpop.eup %2771  ;;  %v2402_v50 = vadd.f32 1.0, %v2770_v15  ;;  %v2405_v1 = vmul.f32 0.5, %v2401_v32 }
 0x55a   : > { %v2404_v7 = vadd.f32 1.0, %v2772_v43  ;;  %v2407_v21 = vmul.f32 0.5, %v2403_v47 }
 0x55b   : > { %v2406_v48 = vmul.f32 0.5, %v2402_v50 }
 0x55c   : > { %v2408_v12 = vmul.f32 0.5, %v2404_v7 }
 0x55d   : > { %v2413_v49 = vcombine.low %v2405_v1, %v2406_v48 }
 0x55e   : > { %v2414_v0 = vcombine.low %v2407_v21, %v2408_v12 }
 0x55f   : > { %v2421_v11 = vrot.slane %v2413_v49, %v2420_v27 }
 0x560   : > { %v2428_v26 = vrot.slane %v2414_v0, %v2420_v27 }
 0x562   : > { %v2429_v60 = vcombine.low %v2421_v11, %v2428_v26 }
 0x564   : > { %v2436_v45 = vrot.slane %v2429_v60, %v2420_v27 }
 0x566   : > { %2442 = vst.msk [vmem:[%s272_s15] sm:$0xf] %vm2440_vm3, %v2436_v45 }
 0x567   : > { %2786 = shalt.err (!%p2783_p3)
}
 0x568   : > { %s2787_s29 = scalar_lea.hbm %s2456_s19, 64  ;;  %s2791_s13 = scalar_lea.hbm %s3776_s7, 128 }
 0x569   : > { %p2788_p4 = scmp.ne.s32.totalorder %s2456_s19, %s2787_s29  ;;  %p2792_p9 = scmp.lt.s32.totalorder %s2456_s19, %s3776_s7 }
 0x56a   : > { %p2793_p10 = scmp.lt.s32.totalorder %s2791_s13, %s2787_s29 }
 0x56b   : > { %p2789_p7 = pnand %p2788_p4, %p2917_p5 }
 0x56c   : > { %p2794_p11 = por %p2793_p10, %p2792_p9 }
 0x56d   : > { %p2790_p8 = pneg %p2789_p7 }
 0x56f   : > { %p2795_p12 = pnand %p2794_p11, %p2790_p8 }
 0x571   : > { %2798 = shalt.err (!%p2795_p12)
}
 0x572   : > { %2594 = dma.vmem_to_hbm [thread:$0]  (%p2917_p5), %s2459_s16, 64, %s2456_s19, %s2444_s20  }
 0x573 PF: > { %p2600_p13 = scmp.ge.s32.totalorder %s2833_s27, 2  ;;  %s2470_s17 = sand.u32 1, %s2821_s24  }
 0x574   : > { %s2471_s18 = scalar_lea.sflag [#allocation5], %s2470_s17 }
 0x575   : > { %p2597_p0 = pnand %p2600_p13, %p2921_p6 }
 0x577   : > { %p2598_p1 = pneg %p2597_p0 }
 0x579   : > { %2816 = dma.done.wait (%p2598_p1), %s2471_s18, 64  }
 0x57a   : > { %2818 = vsyncadd (%p2598_p1), %s2471_s18, 4294967232  ;;  %p17_p2 = scmp.ge.s32.totalorder %s2904_s30, 4   ;;  %s3779_s24 = smov %s2825_s25 }
 0x57b   : > { %s3780_s25 = smov %s2829_s26  ;;  %s3781_s26 = smov %s2915_s10 }
 0x57c   : > { %s3782_s27 = smov %s2904_s30  ;;  %19 = sbr.rel (!%p17_p2) target bundleno = 3 (0x3), region = 85 }
 0x581   :  { %2476 = vsyncpa [#allocation5], 1 }
 0x582   :  { %2478 = vsyncpa [#allocation5 + $0x1], 1 }

</bundles_post_ra>
